<compile_context>
chip_gen: v7x
topology: tpu7x:2x2x1
jax: 0.10.0
libtpu: 0.0.40
codegen_flags: <defaults>
</compile_context>

<pallas_src>
import jax
import jax.numpy as jnp
from jax.experimental import pallas as pl
from jax.experimental.pallas import tpu as pltpu


# ----------------------------------------------------------------------------
# Fused forward kernel (whole GCN forward in one pallas_call)
# ----------------------------------------------------------------------------
def make_fused_gcn_kernel(num_layers, num_adj, adj_idx, out_widths,
                          input_norm, layer_norm, activation, mxu_dtype, eps):
    """Build the kernel body.

    refs = [x, A_0..A_{num_adj-1}, W_0..W_{L-1}, packed_vecs, out]
      packed_vecs rows: [b_0..b_{L-1}, gamma_0..gamma_{L-2}, beta_0..beta_{L-2}] (f32)
    """
    L = num_layers

    def _batchnorm(v, gamma=None, beta=None):
        # Training-mode BatchNorm1d over the node axis, biased variance (PyTorch fwd).
        mean = jnp.mean(v, axis=0, keepdims=True)
        var = jnp.mean((v - mean) ** 2, axis=0, keepdims=True)
        vn = (v - mean) * jax.lax.rsqrt(var + eps)
        if gamma is not None:
            vn = vn * gamma + beta
        return vn

    def kernel(*refs):
        x_ref = refs[0]
        a_refs = refs[1:1 + num_adj]
        w_refs = refs[1 + num_adj:1 + num_adj + L]
        v_ref = refs[1 + num_adj + L]
        o_ref = refs[1 + num_adj + L + 1]

        # Load each *unique* adjacency exactly once (already bf16, shipped from HBM).
        a_vals = [a_refs[j][...] for j in range(num_adj)]

        h = x_ref[...]                       # f32
        if input_norm:
            h = _batchnorm(h)                # affine=False input BatchNorm1d

        for i in range(L):
            width = out_widths[i]
            # Hoisted H @ W: computed exactly once per layer (VMEM-resident).
            hw = jnp.dot(h.astype(mxu_dtype), w_refs[i][...],
                         preferred_element_type=jnp.float32)
            bias = v_ref[i:i + 1, :width]                       # (1, width) f32
            h = jnp.dot(a_vals[adj_idx[i]], hw.astype(mxu_dtype),
                        preferred_element_type=jnp.float32) + bias
            if i < L - 1:
                if layer_norm:
                    g = v_ref[L + i:L + i + 1, :width]
                    bt = v_ref[L + (L - 1) + i:L + (L - 1) + i + 1, :width]
                    h = _batchnorm(h, g, bt)
                h = activation(h)
                # dropout p=0 -> identity

        o_ref[...] = h.astype(o_ref.dtype)

    return kernel


# ----------------------------------------------------------------------------
# Wrapper: bf16 HBM-side operands, adjacency dedup, packed vectors, one pallas_call
# ----------------------------------------------------------------------------
def _round_up(x, m):
    return ((x + m - 1) // m) * m


def _pad2d(a, rows, cols):
    pr, pc = rows - a.shape[0], cols - a.shape[1]
    if pr or pc:
        a = jnp.pad(a, ((0, pr), (0, pc)))
    return a


def gcn_forward(nodeblocks, x, params, *, input_norm=True, layer_norm=False,
                activation=None, use_bf16=True, eps=1e-5):
    """Fused GCN forward. params = {'layers': [(W, b), ...], 'bns': [(gamma, beta), ...]}"""
    if activation is None:
        activation = lambda v: jnp.maximum(v, 0.0)  # relu

    num_layers = len(params["layers"])
    n, f_in = x.shape
    # Padding the node axis would perturb batch-norm statistics; require clean sublanes.
    # (n a multiple of 128 keeps the adjacency contraction lane-dense as well.)
    assert n % 8 == 0, "number of nodes must be a multiple of 8"

    mxu_dtype = jnp.bfloat16 if use_bf16 else jnp.float32

    dims = [f_in] + [w.shape[1] for (w, _) in params["layers"]]
    pdims = [_round_up(d, 128) for d in dims]        # lane-dense feature widths
    num_classes = dims[-1]
    out_widths = [pdims[i + 1] for i in range(num_layers)]

    # --- input features (f32, lane-padded) ---
    x_p = _pad2d(x.astype(jnp.float32), n, pdims[0])

    # --- adjacency: deduplicate identical blocks, ship bf16 ---
    unique_adjs, adj_idx = [], []
    for a in nodeblocks[:num_layers]:
        for j, u in enumerate(unique_adjs):
            if a is u:
                adj_idx.append(j)
                break
        else:
            adj_idx.append(len(unique_adjs))
            unique_adjs.append(a)
    a_list = [a.astype(mxu_dtype) for a in unique_adjs]
    num_adj = len(a_list)

    # --- weights: bf16 + zero-pad in bf16 (no f32 inflation in HBM) ---
    w_list = []
    for i, (w, _) in enumerate(params["layers"]):
        w_list.append(_pad2d(w.astype(mxu_dtype), pdims[i], pdims[i + 1]))

    # --- biases / BN gamma / BN beta packed into ONE small f32 array ---
    pmax = max(pdims[1:])
    vec_rows = []
    for (_, b) in params["layers"]:
        vec_rows.append(jnp.pad(b.astype(jnp.float32), (0, pmax - b.shape[0])))
    if layer_norm:
        for i in range(num_layers - 1):
            g, _ = params["bns"][i]
            vec_rows.append(jnp.pad(g.astype(jnp.float32), (0, pmax - g.shape[0])))
        for i in range(num_layers - 1):
            _, bt = params["bns"][i]
            vec_rows.append(jnp.pad(bt.astype(jnp.float32), (0, pmax - bt.shape[0])))
    vecs = jnp.stack(vec_rows, axis=0)               # (L or 3L-2, pmax) f32

    args = [x_p] + a_list + w_list + [vecs]

    kernel = make_fused_gcn_kernel(num_layers, num_adj, adj_idx, out_widths,
                                   input_norm, layer_norm, activation, mxu_dtype, eps)

    out = pl.pallas_call(
        kernel,
        out_shape=jax.ShapeDtypeStruct((n, pdims[-1]), jnp.float32),
        grid=(1,),
        in_specs=[pl.BlockSpec(a.shape, lambda i: (0, 0)) for a in args],
        out_specs=pl.BlockSpec((n, pdims[-1]), lambda i: (0, 0)),
        compiler_params=pltpu.CompilerParams(dimension_semantics=("arbitrary",)),
    )(*args)

    return out[:, :num_classes]


# ----------------------------------------------------------------------------
# Pure-JAX reference (f32) for a sanity check
# ----------------------------------------------------------------------------
def gcn_reference(nodeblocks, x, params, *, input_norm=True, layer_norm=False, eps=1e-5):
    def bn(v, g=None, b=None):
        m = jnp.mean(v, axis=0, keepdims=True)
        var = jnp.mean((v - m) ** 2, axis=0, keepdims=True)
        vn = (v - m) * jax.lax.rsqrt(var + eps)
        if g is not None:
            vn = vn * g + b
        return vn

    L = len(params["layers"])
    h = bn(x) if input_norm else x
    for i, (w, b) in enumerate(params["layers"]):
        h = nodeblocks[i] @ (h @ w) + b
        if i < L - 1:
            if layer_norm:
                g, bt = params["bns"][i]
                h = bn(h, g, bt)
            h = jnp.maximum(h, 0.0)
    return h


# ----------------------------------------------------------------------------
# Parameter / input construction (deterministic, in-script)
# ----------------------------------------------------------------------------
def init_params(key, features_dim, hidden_dim, num_classes, num_layers):
    dims = [features_dim] + [hidden_dim] * (num_layers - 1) + [num_classes]
    layers, bns = [], []
    for i in range(num_layers):
        key, kw = jax.random.split(key)
        fin, fout = dims[i], dims[i + 1]
        scale = (2.0 / (fin + fout)) ** 0.5  # glorot-ish, deterministic
        w = scale * jax.random.normal(kw, (fin, fout), dtype=jnp.float32)
        b = jnp.zeros((fout,), dtype=jnp.float32)
        layers.append((w, b))
        if i < num_layers - 1:
            bns.append((jnp.ones((fout,), jnp.float32), jnp.zeros((fout,), jnp.float32)))
    return {"layers": layers, "bns": bns}


def make_norm_adjacency(key, n):
    a = jax.random.bernoulli(key, p=0.1, shape=(n, n)).astype(jnp.float32)
    a = jnp.maximum(a, a.T)                       # symmetrize
    a = a + jnp.eye(n, dtype=jnp.float32)         # self loops
    d = jnp.sum(a, axis=1)
    d_inv_sqrt = 1.0 / jnp.sqrt(d)
    return a * d_inv_sqrt[:, None] * d_inv_sqrt[None, :]


if __name__ == "__main__":
    N = 128            # number of nodes
    FEATURES = 32      # features_dim  (padded to 128 lanes inside the wrapper)
    HIDDEN = 64        # hidden_dim    (padded to 128 lanes inside the wrapper)
    CLASSES = 16       # num_classes   (padded to 128 lanes, sliced back at the end)
    NUM_LAYERS = 3

    key = jax.random.PRNGKey(0)
    kx, ka, kp = jax.random.split(key, 3)

    x = jax.random.normal(kx, (N, FEATURES), dtype=jnp.float32)
    a_norm = make_norm_adjacency(ka, N)
    nodeblocks = [a_norm] * NUM_LAYERS            # same block for every layer -> deduped to 1 DMA

    params = init_params(kp, FEATURES, HIDDEN, CLASSES, NUM_LAYERS)

    out = gcn_forward(nodeblocks, x, params,
                      input_norm=True,   # module default
                      layer_norm=True)   # exercise the per-layer BatchNorm path too
    out = jax.block_until_ready(out)

    assert out.shape == (N, CLASSES), out.shape
    assert bool(jnp.all(jnp.isfinite(out)))

    # Loose sanity check vs a pure-f32 reference (kernel uses bf16 MXU inputs).
    ref = gcn_reference(nodeblocks, x, params, input_norm=True, layer_norm=True)
    max_err = float(jnp.max(jnp.abs(out - ref)))
    scale = float(jnp.max(jnp.abs(ref))) + 1.0
    assert max_err < 0.25 * scale, (max_err, scale)

    print("KERNEL_OK")
</pallas_src>

<mosaic_0001>
module attributes {stable_mosaic.version = 11 : i64} {
  func.func @kernel(%arg0: i32, %arg1: memref<128x128xf32, #tpu.memory_space<vmem>>, %arg2: memref<128x128xbf16, #tpu.memory_space<vmem>>, %arg3: memref<128x128xbf16, #tpu.memory_space<vmem>>, %arg4: memref<128x128xbf16, #tpu.memory_space<vmem>>, %arg5: memref<128x128xbf16, #tpu.memory_space<vmem>>, %arg6: memref<7x128xf32, #tpu.memory_space<vmem>>, %arg7: memref<128x128xf32, #tpu.memory_space<vmem>>) attributes {dimension_semantics = [#tpu.dimension_semantics<arbitrary>], iteration_bounds = array<i64: 1>, scalar_prefetch = 0 : i64, scratch_operands = 0 : i64, tpu.core_type = #tpu.core_type<tc>, window_params = [{pipeline_mode = #tpu.pipeline_mode<synchronous>, transform_indices = @transform_0, window_bounds = array<i64: 128, 128>}, {pipeline_mode = #tpu.pipeline_mode<synchronous>, transform_indices = @transform_1, window_bounds = array<i64: 128, 128>}, {pipeline_mode = #tpu.pipeline_mode<synchronous>, transform_indices = @transform_2, window_bounds = array<i64: 128, 128>}, {pipeline_mode = #tpu.pipeline_mode<synchronous>, transform_indices = @transform_3, window_bounds = array<i64: 128, 128>}, {pipeline_mode = #tpu.pipeline_mode<synchronous>, transform_indices = @transform_4, window_bounds = array<i64: 128, 128>}, {pipeline_mode = #tpu.pipeline_mode<synchronous>, transform_indices = @transform_5, window_bounds = array<i64: 7, 128>}, {pipeline_mode = #tpu.pipeline_mode<synchronous>, transform_indices = @transform_6, window_bounds = array<i64: 128, 128>}]} {
    %c0 = arith.constant 0 : index
    %c0_0 = arith.constant 0 : index
    %0 = vector.load %arg2[%c0, %c0_0] : memref<128x128xbf16, #tpu.memory_space<vmem>>, vector<128x128xbf16>
    %c0_1 = arith.constant 0 : index
    %c0_2 = arith.constant 0 : index
    %1 = vector.load %arg1[%c0_1, %c0_2] : memref<128x128xf32, #tpu.memory_space<vmem>>, vector<128x128xf32>
    %cst = arith.constant dense<0.000000e+00> : vector<128xf32>
    %2 = vector.multi_reduction <add>, %1, %cst [0] : vector<128x128xf32> to vector<128xf32>
    %3 = vector.shape_cast %2 : vector<128xf32> to vector<1x128xf32>
    %cst_3 = arith.constant 1.280000e+02 : f32
    %4 = vector.broadcast %cst_3 : f32 to vector<1x128xf32>
    %5 = arith.divf %3, %4 : vector<1x128xf32>
    %6 = vector.broadcast %5 : vector<1x128xf32> to vector<128x128xf32>
    %7 = arith.subf %1, %6 : vector<128x128xf32>
    %8 = arith.mulf %7, %7 : vector<128x128xf32>
    %cst_4 = arith.constant dense<0.000000e+00> : vector<128xf32>
    %9 = vector.multi_reduction <add>, %8, %cst_4 [0] : vector<128x128xf32> to vector<128xf32>
    %10 = vector.shape_cast %9 : vector<128xf32> to vector<1x128xf32>
    %cst_5 = arith.constant 1.280000e+02 : f32
    %11 = vector.broadcast %cst_5 : f32 to vector<1x128xf32>
    %12 = arith.divf %10, %11 : vector<1x128xf32>
    %13 = vector.broadcast %5 : vector<1x128xf32> to vector<128x128xf32>
    %14 = arith.subf %1, %13 : vector<128x128xf32>
    %cst_6 = arith.constant 9.99999974E-6 : f32
    %15 = vector.broadcast %cst_6 : f32 to vector<1x128xf32>
    %16 = arith.addf %12, %15 : vector<1x128xf32>
    %17 = math.rsqrt %16 : vector<1x128xf32>
    %18 = vector.broadcast %17 : vector<1x128xf32> to vector<128x128xf32>
    %19 = arith.mulf %14, %18 : vector<128x128xf32>
    %20 = arith.truncf %19 : vector<128x128xf32> to vector<128x128xbf16>
    %c0_7 = arith.constant 0 : index
    %c0_8 = arith.constant 0 : index
    %21 = vector.load %arg3[%c0_7, %c0_8] : memref<128x128xbf16, #tpu.memory_space<vmem>>, vector<128x128xbf16>
    %cst_9 = arith.constant dense<0.000000e+00> : vector<128x128xf32>
    %22 = tpu.matmul %20, %21, %cst_9 {dimension_numbers = #tpu.dot_dimension_numbers<[1], [0], [0], [1], [0, 0, 1, 1], [], []>} : vector<128x128xbf16>, vector<128x128xbf16>, vector<128x128xf32> -> vector<128x128xf32>
    %c0_10 = arith.constant 0 : index
    %c0_11 = arith.constant 0 : index
    %23 = vector.load %arg6[%c0_10, %c0_11] : memref<7x128xf32, #tpu.memory_space<vmem>>, vector<1x128xf32>
    %24 = arith.truncf %22 : vector<128x128xf32> to vector<128x128xbf16>
    %cst_12 = arith.constant dense<0.000000e+00> : vector<128x128xf32>
    %25 = tpu.matmul %0, %24, %cst_12 {dimension_numbers = #tpu.dot_dimension_numbers<[1], [0], [0], [1], [0, 0, 1, 1], [], []>} : vector<128x128xbf16>, vector<128x128xbf16>, vector<128x128xf32> -> vector<128x128xf32>
    %26 = vector.broadcast %23 : vector<1x128xf32> to vector<128x128xf32>
    %27 = arith.addf %25, %26 : vector<128x128xf32>
    %c3 = arith.constant 3 : index
    %c0_13 = arith.constant 0 : index
    %28 = vector.load %arg6[%c3, %c0_13] : memref<7x128xf32, #tpu.memory_space<vmem>>, vector<1x128xf32>
    %c5 = arith.constant 5 : index
    %c0_14 = arith.constant 0 : index
    %29 = vector.load %arg6[%c5, %c0_14] : memref<7x128xf32, #tpu.memory_space<vmem>>, vector<1x128xf32>
    %cst_15 = arith.constant dense<0.000000e+00> : vector<128xf32>
    %30 = vector.multi_reduction <add>, %27, %cst_15 [0] : vector<128x128xf32> to vector<128xf32>
    %31 = vector.shape_cast %30 : vector<128xf32> to vector<1x128xf32>
    %cst_16 = arith.constant 1.280000e+02 : f32
    %32 = vector.broadcast %cst_16 : f32 to vector<1x128xf32>
    %33 = arith.divf %31, %32 : vector<1x128xf32>
    %34 = vector.broadcast %33 : vector<1x128xf32> to vector<128x128xf32>
    %35 = arith.subf %27, %34 : vector<128x128xf32>
    %36 = arith.mulf %35, %35 : vector<128x128xf32>
    %cst_17 = arith.constant dense<0.000000e+00> : vector<128xf32>
    %37 = vector.multi_reduction <add>, %36, %cst_17 [0] : vector<128x128xf32> to vector<128xf32>
    %38 = vector.shape_cast %37 : vector<128xf32> to vector<1x128xf32>
    %cst_18 = arith.constant 1.280000e+02 : f32
    %39 = vector.broadcast %cst_18 : f32 to vector<1x128xf32>
    %40 = arith.divf %38, %39 : vector<1x128xf32>
    %41 = vector.broadcast %33 : vector<1x128xf32> to vector<128x128xf32>
    %42 = arith.subf %27, %41 : vector<128x128xf32>
    %cst_19 = arith.constant 9.99999974E-6 : f32
    %43 = vector.broadcast %cst_19 : f32 to vector<1x128xf32>
    %44 = arith.addf %40, %43 : vector<1x128xf32>
    %45 = math.rsqrt %44 : vector<1x128xf32>
    %46 = vector.broadcast %45 : vector<1x128xf32> to vector<128x128xf32>
    %47 = arith.mulf %42, %46 : vector<128x128xf32>
    %48 = vector.broadcast %28 : vector<1x128xf32> to vector<128x128xf32>
    %49 = arith.mulf %47, %48 : vector<128x128xf32>
    %50 = vector.broadcast %29 : vector<1x128xf32> to vector<128x128xf32>
    %51 = arith.addf %49, %50 : vector<128x128xf32>
    %cst_20 = arith.constant 0.000000e+00 : f32
    %52 = vector.broadcast %cst_20 : f32 to vector<128x128xf32>
    %53 = arith.maximumf %51, %52 : vector<128x128xf32>
    %54 = arith.truncf %53 : vector<128x128xf32> to vector<128x128xbf16>
    %c0_21 = arith.constant 0 : index
    %c0_22 = arith.constant 0 : index
    %55 = vector.load %arg4[%c0_21, %c0_22] : memref<128x128xbf16, #tpu.memory_space<vmem>>, vector<128x128xbf16>
    %cst_23 = arith.constant dense<0.000000e+00> : vector<128x128xf32>
    %56 = tpu.matmul %54, %55, %cst_23 {dimension_numbers = #tpu.dot_dimension_numbers<[1], [0], [0], [1], [0, 0, 1, 1], [], []>} : vector<128x128xbf16>, vector<128x128xbf16>, vector<128x128xf32> -> vector<128x128xf32>
    %c1 = arith.constant 1 : index
    %c0_24 = arith.constant 0 : index
    %57 = vector.load %arg6[%c1, %c0_24] : memref<7x128xf32, #tpu.memory_space<vmem>>, vector<1x128xf32>
    %58 = arith.truncf %56 : vector<128x128xf32> to vector<128x128xbf16>
    %cst_25 = arith.constant dense<0.000000e+00> : vector<128x128xf32>
    %59 = tpu.matmul %0, %58, %cst_25 {dimension_numbers = #tpu.dot_dimension_numbers<[1], [0], [0], [1], [0, 0, 1, 1], [], []>} : vector<128x128xbf16>, vector<128x128xbf16>, vector<128x128xf32> -> vector<128x128xf32>
    %60 = vector.broadcast %57 : vector<1x128xf32> to vector<128x128xf32>
    %61 = arith.addf %59, %60 : vector<128x128xf32>
    %c4 = arith.constant 4 : index
    %c0_26 = arith.constant 0 : index
    %62 = vector.load %arg6[%c4, %c0_26] : memref<7x128xf32, #tpu.memory_space<vmem>>, vector<1x128xf32>
    %c6 = arith.constant 6 : index
    %c0_27 = arith.constant 0 : index
    %63 = vector.load %arg6[%c6, %c0_27] : memref<7x128xf32, #tpu.memory_space<vmem>>, vector<1x128xf32>
    %cst_28 = arith.constant dense<0.000000e+00> : vector<128xf32>
    %64 = vector.multi_reduction <add>, %61, %cst_28 [0] : vector<128x128xf32> to vector<128xf32>
    %65 = vector.shape_cast %64 : vector<128xf32> to vector<1x128xf32>
    %cst_29 = arith.constant 1.280000e+02 : f32
    %66 = vector.broadcast %cst_29 : f32 to vector<1x128xf32>
    %67 = arith.divf %65, %66 : vector<1x128xf32>
    %68 = vector.broadcast %67 : vector<1x128xf32> to vector<128x128xf32>
    %69 = arith.subf %61, %68 : vector<128x128xf32>
    %70 = arith.mulf %69, %69 : vector<128x128xf32>
    %cst_30 = arith.constant dense<0.000000e+00> : vector<128xf32>
    %71 = vector.multi_reduction <add>, %70, %cst_30 [0] : vector<128x128xf32> to vector<128xf32>
    %72 = vector.shape_cast %71 : vector<128xf32> to vector<1x128xf32>
    %cst_31 = arith.constant 1.280000e+02 : f32
    %73 = vector.broadcast %cst_31 : f32 to vector<1x128xf32>
    %74 = arith.divf %72, %73 : vector<1x128xf32>
    %75 = vector.broadcast %67 : vector<1x128xf32> to vector<128x128xf32>
    %76 = arith.subf %61, %75 : vector<128x128xf32>
    %cst_32 = arith.constant 9.99999974E-6 : f32
    %77 = vector.broadcast %cst_32 : f32 to vector<1x128xf32>
    %78 = arith.addf %74, %77 : vector<1x128xf32>
    %79 = math.rsqrt %78 : vector<1x128xf32>
    %80 = vector.broadcast %79 : vector<1x128xf32> to vector<128x128xf32>
    %81 = arith.mulf %76, %80 : vector<128x128xf32>
    %82 = vector.broadcast %62 : vector<1x128xf32> to vector<128x128xf32>
    %83 = arith.mulf %81, %82 : vector<128x128xf32>
    %84 = vector.broadcast %63 : vector<1x128xf32> to vector<128x128xf32>
    %85 = arith.addf %83, %84 : vector<128x128xf32>
    %cst_33 = arith.constant 0.000000e+00 : f32
    %86 = vector.broadcast %cst_33 : f32 to vector<128x128xf32>
    %87 = arith.maximumf %85, %86 : vector<128x128xf32>
    %88 = arith.truncf %87 : vector<128x128xf32> to vector<128x128xbf16>
    %c0_34 = arith.constant 0 : index
    %c0_35 = arith.constant 0 : index
    %89 = vector.load %arg5[%c0_34, %c0_35] : memref<128x128xbf16, #tpu.memory_space<vmem>>, vector<128x128xbf16>
    %cst_36 = arith.constant dense<0.000000e+00> : vector<128x128xf32>
    %90 = tpu.matmul %88, %89, %cst_36 {dimension_numbers = #tpu.dot_dimension_numbers<[1], [0], [0], [1], [0, 0, 1, 1], [], []>} : vector<128x128xbf16>, vector<128x128xbf16>, vector<128x128xf32> -> vector<128x128xf32>
    %c2 = arith.constant 2 : index
    %c0_37 = arith.constant 0 : index
    %91 = vector.load %arg6[%c2, %c0_37] : memref<7x128xf32, #tpu.memory_space<vmem>>, vector<1x128xf32>
    %92 = arith.truncf %90 : vector<128x128xf32> to vector<128x128xbf16>
    %cst_38 = arith.constant dense<0.000000e+00> : vector<128x128xf32>
    %93 = tpu.matmul %0, %92, %cst_38 {dimension_numbers = #tpu.dot_dimension_numbers<[1], [0], [0], [1], [0, 0, 1, 1], [], []>} : vector<128x128xbf16>, vector<128x128xbf16>, vector<128x128xf32> -> vector<128x128xf32>
    %94 = vector.broadcast %91 : vector<1x128xf32> to vector<128x128xf32>
    %95 = arith.addf %93, %94 : vector<128x128xf32>
    %c0_39 = arith.constant 0 : index
    %c0_40 = arith.constant 0 : index
    %96 = vector.load %arg7[%c0_39, %c0_40] : memref<128x128xf32, #tpu.memory_space<vmem>>, vector<128x128xf32>
    tpu.vector_store %arg7[%c0_39, %c0_40], %95 {strides = array<i32>} : memref<128x128xf32, #tpu.memory_space<vmem>>, vector<128x128xf32>,
    return
  }
  func.func @transform_0(%arg0: i32) -> (i32, i32) {
    %c0_i32 = arith.constant 0 : i32
    %c0_i32_0 = arith.constant 0 : i32
    %c0_i32_1 = arith.constant 0 : i32
    return %c0_i32, %c0_i32_0 : i32, i32
  }
  func.func @transform_1(%arg0: i32) -> (i32, i32) {
    %c0_i32 = arith.constant 0 : i32
    %c0_i32_0 = arith.constant 0 : i32
    %c0_i32_1 = arith.constant 0 : i32
    return %c0_i32, %c0_i32_0 : i32, i32
  }
  func.func @transform_2(%arg0: i32) -> (i32, i32) {
    %c0_i32 = arith.constant 0 : i32
    %c0_i32_0 = arith.constant 0 : i32
    %c0_i32_1 = arith.constant 0 : i32
    return %c0_i32, %c0_i32_0 : i32, i32
  }
  func.func @transform_3(%arg0: i32) -> (i32, i32) {
    %c0_i32 = arith.constant 0 : i32
    %c0_i32_0 = arith.constant 0 : i32
    %c0_i32_1 = arith.constant 0 : i32
    return %c0_i32, %c0_i32_0 : i32, i32
  }
  func.func @transform_4(%arg0: i32) -> (i32, i32) {
    %c0_i32 = arith.constant 0 : i32
    %c0_i32_0 = arith.constant 0 : i32
    %c0_i32_1 = arith.constant 0 : i32
    return %c0_i32, %c0_i32_0 : i32, i32
  }
  func.func @transform_5(%arg0: i32) -> (i32, i32) {
    %c0_i32 = arith.constant 0 : i32
    %c0_i32_0 = arith.constant 0 : i32
    %c0_i32_1 = arith.constant 0 : i32
    return %c0_i32, %c0_i32_0 : i32, i32
  }
  func.func @transform_6(%arg0: i32) -> (i32, i32) {
    %c0_i32 = arith.constant 0 : i32
    %c0_i32_0 = arith.constant 0 : i32
    %c0_i32_1 = arith.constant 0 : i32
    return %c0_i32, %c0_i32_0 : i32, i32
  }
}

</mosaic_0001>

<bundles_post_ra>
// kernel: tpu_custom_call.1
= control target key start
LH: loop header
LB: loop body
LE: loop exit
PB: predicated region body
PF: predicated region fallthrough
CT: control target
= control target key end

     0   :  { %11 = vsyncpa [#allocation3], 0  ;;  %s2307_s0 = inlined_call_operand.hbm [shape: f32[128,128], index: 0, kind: input, shape index: {}]   ;;  %s2308_s1 = inlined_call_operand.hbm [shape: bf16[128,128], index: 1, kind: input, shape index: {}]   ;;  %s2309_s2 = inlined_call_operand.hbm [shape: bf16[128,128], index: 2, kind: input, shape index: {}]   ;;  %s2310_s3 = inlined_call_operand.hbm [shape: bf16[128,128], index: 3, kind: input, shape index: {}]   ;;  %s2311_s4 = inlined_call_operand.hbm [shape: bf16[128,128], index: 4, kind: input, shape index: {}]   ;;  %s2312_s5 = inlined_call_operand.vmem [shape: f32[7,128], index: 5, kind: input, shape index: {}]   ;;  %s2313_s6 = inlined_call_operand.hbm [shape: f32[128,128], index: 6, kind: output, shape index: {}]  }
   0x1   :  { %12 = vsyncpa [#allocation6], 0 }
   0x2   :  { %13 = vsyncpa [#allocation9], 0 }
   0x3   :  { %14 = vsyncpa [#allocation4], 0  ;;  %s1966_s21 = smov [#allocation5]   ;;  %s1826_s25 = scalar_lea.hbm %s2308_s1, 1024 }
   0x4   :  { %s32_s22 = sshll.u32 %s1966_s21, 4  ;;  %p1827_p0 = scmp.ne.s32.totalorder %s2308_s1, %s1826_s25  ;;  %s33_s22 = int_to_ptr.vmem [resolvable:$true] %s32_s22 }
   0x5   :  { %p1830_p1 = scmp.lt.u32.totalorder %s1826_s25, %s2308_s1 }
   0x7   :  { %p1832_p2 = pnand %p1830_p1, %p1827_p0 }
   0x9   :  { %1835 = shalt.err (!%p1832_p2)
}
   0xa   :  { %s1836_s30 = scalar_lea.vmem %s33_s22, 1024  ;;  %p1841_p4 = scmp.lt.s32.totalorder %s33_s22, %s33_s22 }
   0xb   :  { %p1837_p3 = scmp.ne.s32.totalorder %s33_s22, %s1836_s30  ;;  %p1842_p5 = scmp.lt.s32.totalorder %s1836_s30, %s1836_s30 }
   0xd   :  { %p1843_p6 = por %p1842_p5, %p1841_p4 }
   0xf   :  { %p1844_p7 = pnand %p1843_p6, %p1837_p3 }
  0x11   :  { %1847 = shalt.err (!%p1844_p7)
}
  0x12   :  { %s1967_s7 = smov 64   ;;  %s1968_s8 = smov 4  }
  0x13   :  { %38 = dma.hbm_to_vmem [thread:$0]  %s2308_s1, 1024, %s33_s22, [#allocation6], %s1967_s7, %s1967_s7, %s1968_s8  }
  0x14   :  { %s1969_s11 = smov [#allocation8]   ;;  %s1970_s13 = smov [#allocation2]  }
  0x15   :  { %s56_s12 = sshll.u32 %s1969_s11, 4  ;;  %s20_s14 = sshll.u32 %s1970_s13, 4  ;;  %s57_s12 = int_to_ptr.vmem [resolvable:$true] %s56_s12  ;;  %s21_s14 = int_to_ptr.vmem [resolvable:$true] %s20_s14 }
  0x16   :  { %s1848_s17 = scalar_lea.hbm %s2310_s3, 1024 }
  0x17   :  { %p1849_p8 = scmp.ne.s32.totalorder %s2310_s3, %s1848_s17  ;;  %p1852_p9 = scmp.lt.u32.totalorder %s1848_s17, %s2310_s3 }
  0x19   :  { %p1854_p10 = pnand %p1852_p9, %p1849_p8 }
  0x1b   :  { %1857 = shalt.err (!%p1854_p10)
}
  0x1c   :  { %s1858_s1 = scalar_lea.vmem %s57_s12, 1024  ;;  %p1863_p12 = scmp.lt.s32.totalorder %s57_s12, %s57_s12 }
  0x1d   :  { %p1859_p11 = scmp.ne.s32.totalorder %s57_s12, %s1858_s1  ;;  %p1864_p13 = scmp.lt.s32.totalorder %s1858_s1, %s1858_s1 }
  0x1f   :  { %p1865_p0 = por %p1864_p13, %p1863_p12 }
  0x21   :  { %p1866_p1 = pnand %p1865_p0, %p1859_p11 }
  0x23   :  { %1869 = shalt.err (!%p1866_p1)
}
  0x24   :  { %62 = dma.hbm_to_vmem [thread:$0]  %s2310_s3, 1024, %s57_s12, [#allocation9], %s1967_s7, %s1967_s7, %s1968_s8  }
  0x25   :  { %s1870_s26 = scalar_lea.hbm %s2307_s0, 2048 }
  0x26   :  { %p1871_p2 = scmp.ne.s32.totalorder %s2307_s0, %s1870_s26  ;;  %p1874_p3 = scmp.lt.u32.totalorder %s1870_s26, %s2307_s0 }
  0x28   :  { %p1876_p4 = pnand %p1874_p3, %p1871_p2 }
  0x2a   :  { %1879 = shalt.err (!%p1876_p4)
}
  0x2b   :  { %s1880_s9 = scalar_lea.vmem %s21_s14, 2048  ;;  %p1885_p6 = scmp.lt.s32.totalorder %s21_s14, %s21_s14 }
  0x2c   :  { %p1881_p5 = scmp.ne.s32.totalorder %s21_s14, %s1880_s9  ;;  %p1886_p7 = scmp.lt.s32.totalorder %s1880_s9, %s1880_s9 }
  0x2e   :  { %p1887_p8 = por %p1886_p7, %p1885_p6 }
  0x30   :  { %p1888_p9 = pnand %p1887_p8, %p1881_p5 }
  0x32   :  { %1891 = shalt.err (!%p1888_p9)
}
  0x33   :  { %s1971_s3 = smov 128   ;;  %s1972_s10 = smov 8  }
  0x34   :  { %26 = dma.hbm_to_vmem [thread:$0]  %s2307_s0, 2048, %s21_s14, [#allocation3], %s1971_s3, %s1971_s3, %s1972_s10  }
  0x35   :  { %s1973_s13 = smov [#allocation7]   ;;  %s1974_s16 = smov [#allocation10]  }
  0x36   :  { %s44_s15 = sshll.u32 %s1973_s13, 4  ;;  %s68_s17 = sshll.u32 %s1974_s16, 4  ;;  %s45_s15 = int_to_ptr.vmem [resolvable:$true] %s44_s15  ;;  %s69_s17 = int_to_ptr.vmem [resolvable:$true] %s68_s17 }
  0x37   :  { %s1892_s20 = scalar_lea.hbm %s2309_s2, 1024 }
  0x38   :  { %p1893_p10 = scmp.ne.s32.totalorder %s2309_s2, %s1892_s20  ;;  %p1896_p11 = scmp.lt.u32.totalorder %s1892_s20, %s2309_s2 }
  0x3a   :  { %p1898_p12 = pnand %p1896_p11, %p1893_p10 }
  0x3c   :  { %1901 = shalt.err (!%p1898_p12)
}
  0x3d   :  { %s1902_s0 = scalar_lea.vmem %s45_s15, 1024  ;;  %p1907_p0 = scmp.lt.s32.totalorder %s45_s15, %s45_s15 }
  0x3e   :  { %p1903_p13 = scmp.ne.s32.totalorder %s45_s15, %s1902_s0  ;;  %p1908_p1 = scmp.lt.s32.totalorder %s1902_s0, %s1902_s0 }
  0x40   :  { %p1909_p2 = por %p1908_p1, %p1907_p0 }
  0x42   :  { %p1910_p3 = pnand %p1909_p2, %p1903_p13 }
  0x44   :  { %1913 = shalt.err (!%p1910_p3)
}
  0x45   :  { %50 = dma.hbm_to_vmem [thread:$0]  %s2309_s2, 1024, %s45_s15, [#allocation6], %s1967_s7, %s1967_s7, %s1968_s8  }
  0x46   :  { %s1914_s27 = scalar_lea.hbm %s2311_s4, 1024 }
  0x47   :  { %p1915_p4 = scmp.ne.s32.totalorder %s2311_s4, %s1914_s27  ;;  %p1918_p5 = scmp.lt.u32.totalorder %s1914_s27, %s2311_s4 }
  0x49   :  { %p1920_p6 = pnand %p1918_p5, %p1915_p4 }
  0x4b   :  { %1923 = shalt.err (!%p1920_p6)
}
  0x4c   :  { %s1924_s11 = scalar_lea.vmem %s69_s17, 1024  ;;  %p1929_p8 = scmp.lt.s32.totalorder %s69_s17, %s69_s17 }
  0x4d   :  { %p1925_p7 = scmp.ne.s32.totalorder %s69_s17, %s1924_s11  ;;  %p1930_p9 = scmp.lt.s32.totalorder %s1924_s11, %s1924_s11 }
  0x4f   :  { %p1931_p10 = por %p1930_p9, %p1929_p8 }
  0x51   :  { %p1932_p11 = pnand %p1931_p10, %p1925_p7 }
  0x53   :  { %1935 = shalt.err (!%p1932_p11)
}
  0x54   :  { %74 = dma.hbm_to_vmem [thread:$0]  %s2311_s4, 1024, %s69_s17, [#allocation9], %s1967_s7, %s1967_s7, %s1968_s8  }
  0x55   :  { %1958 = dma.done.wait [#allocation3], 2048  }
  0x56   :  { %1959 = vsyncadd [#allocation3], 4294965248 }
  0x57   :  { %1960 = dma.done.wait [#allocation6], 2048  }
  0x58   :  { %1961 = vsyncadd [#allocation6], 4294965248 }
  0x59   :  { %1962 = dma.done.wait [#allocation9], 2048  }
  0x5a   :  { %1963 = vsyncadd [#allocation9], 4294965248  ;;  %v1781_v0 = vld [vmem:[#allocation7] sm:$0xff]   ;;  %v1782_v1 = vld [vmem:[#allocation7 + $0x8] sm:$0xff]  }
  0x5b   :  { %1579 = vmatprep.subr.bf16.mxu0 %v1781_v0  ;;  %v1783_v2 = vld [vmem:[#allocation7 + $0x10] sm:$0xff]   ;;  %v1784_v3 = vld [vmem:[#allocation7 + $0x18] sm:$0xff]   ;;  %v109_v4 = vld [vmem:[#allocation2] sm:$0xff] }
  0x5c   :  { %1580 = vmatpush3.bf16.msra.mxu0 %v1781_v0  ;;  %v110_v5 = vld [vmem:[#allocation2 + $0x8] sm:$0xff]  ;;  %v111_v6 = vld [vmem:[#allocation2 + $0x10] sm:$0xff]  ;;  %v112_v8 = vld [vmem:[#allocation2 + $0x18] sm:$0xff] }
  0x5d   :  { %1581 = vmatprep.subr.bf16.mxu0 %v1782_v1  ;;  %v125_v7 = vadd.f32 %v110_v5, %v109_v4  ;;  %v1785_v10 = vld [vmem:[#allocation7 + $0x20] sm:$0xff]   ;;  %v114_v12 = vld [vmem:[#allocation2 + $0x28] sm:$0xff]  ;;  %v115_v15 = vld [vmem:[#allocation2 + $0x30] sm:$0xff] }
  0x5e   :  { %v113_v11 = vld [vmem:[#allocation2 + $0x20] sm:$0xff]  ;;  %v1786_v14 = vld [vmem:[#allocation7 + $0x28] sm:$0xff]   ;;  %v116_v17 = vld [vmem:[#allocation2 + $0x38] sm:$0xff] }
  0x5f   :  { %v126_v9 = vadd.f32 %v125_v7, %v111_v6  ;;  %v1787_v19 = vld [vmem:[#allocation7 + $0x30] sm:$0xff]   ;;  %v117_v20 = vld [vmem:[#allocation2 + $0x40] sm:$0xff]  ;;  %v118_v22 = vld [vmem:[#allocation2 + $0x48] sm:$0xff] }
  0x60   :  { %1582 = vmatpush3.bf16.msra.mxu0 %v1782_v1  ;;  %v1788_v24 = vld [vmem:[#allocation7 + $0x38] sm:$0xff]   ;;  %v119_v25 = vld [vmem:[#allocation2 + $0x50] sm:$0xff]  ;;  %v121_v29 = vld [vmem:[#allocation2 + $0x60] sm:$0xff] }
  0x61   :  { %1583 = vmatprep.subr.bf16.mxu0 %v1783_v2  ;;  %v127_v13 = vadd.f32 %v126_v9, %v112_v8  ;;  %v120_v27 = vld [vmem:[#allocation2 + $0x58] sm:$0xff]  ;;  %v122_v32 = vld [vmem:[#allocation2 + $0x68] sm:$0xff]  ;;  %v123_v34 = vld [vmem:[#allocation2 + $0x70] sm:$0xff] }
  0x62   :  { %v124_v36 = vld [vmem:[#allocation2 + $0x78] sm:$0xff] }
  0x63   :  { %v128_v16 = vadd.f32 %v127_v13, %v113_v11 }
  0x64   :  { %1584 = vmatpush3.bf16.msra.mxu0 %v1783_v2 }
  0x65   :  { %1585 = vmatprep.subr.bf16.mxu0 %v1784_v3  ;;  %v129_v18 = vadd.f32 %v128_v16, %v114_v12 }
  0x67   :  { %v130_v21 = vadd.f32 %v129_v18, %v115_v15 }
  0x68   :  { %1586 = vmatpush3.bf16.msra.mxu0 %v1784_v3 }
  0x69   :  { %1587 = vmatprep.subr.bf16.mxu0 %v1785_v10  ;;  %v131_v23 = vadd.f32 %v130_v21, %v116_v17 }
  0x6b   :  { %v132_v26 = vadd.f32 %v131_v23, %v117_v20 }
  0x6c   :  { %1588 = vmatpush3.bf16.msra.mxu0 %v1785_v10 }
  0x6d   :  { %1589 = vmatprep.subr.bf16.mxu0 %v1786_v14  ;;  %v133_v28 = vadd.f32 %v132_v26, %v118_v22 }
  0x6f   :  { %v134_v30 = vadd.f32 %v133_v28, %v119_v25 }
  0x70   :  { %1590 = vmatpush3.bf16.msra.mxu0 %v1786_v14 }
  0x71   :  { %1591 = vmatprep.subr.bf16.mxu0 %v1787_v19  ;;  %v135_v31 = vadd.f32 %v134_v30, %v120_v27 }
  0x73   :  { %v136_v33 = vadd.f32 %v135_v31, %v121_v29 }
  0x74   :  { %1592 = vmatpush3.bf16.msra.mxu0 %v1787_v19 }
  0x75   :  { %1593 = vmatprep.subr.bf16.mxu0 %v1788_v24  ;;  %v137_v35 = vadd.f32 %v136_v33, %v122_v32 }
  0x77   :  { %v138_v37 = vadd.f32 %v137_v35, %v123_v34 }
  0x78   :  { %1594 = vmatpush3.bf16.msra.mxu0 %v1788_v24 }
  0x79   :  { %v139_v38 = vadd.f32 %v138_v37, %v124_v36 }
  0x7b   :  { %v140_v39 = vrot.slane %v139_v38, 4 }
  0x7d   :  { %v141_v40 = vadd.f32 %v140_v39, %v139_v38 }
  0x7f   :  { %v142_v41 = vrot.slane %v141_v40, 2 }
  0x81   :  { %v143_v42 = vadd.f32 %v142_v41, %v141_v40 }
  0x83   :  { %v144_v43 = vrot.slane %v143_v42, 1 }
  0x85   :  { %v145_v44 = vadd.f32 %v144_v43, %v143_v42 }
  0x87   :  { %v147_v45 = vmul.f32 0.0078125, %v145_v44 }
  0x89   :  { %v148_v46 = vsub.f32 %v109_v4, %v147_v45  ;;  %v149_v47 = vsub.f32 %v110_v5, %v147_v45  ;;  %v150_v48 = vsub.f32 %v111_v6, %v147_v45  ;;  %v151_v49 = vsub.f32 %v112_v8, %v147_v45 }
  0x8a   :  { %v152_v52 = vsub.f32 %v113_v11, %v147_v45  ;;  %v153_v54 = vsub.f32 %v114_v12, %v147_v45  ;;  %v154_v57 = vsub.f32 %v115_v15, %v147_v45  ;;  %v155_v60 = vsub.f32 %v116_v17, %v147_v45 }
  0x8b   :  { %v164_v50 = vmul.f32 %v148_v46, %v148_v46  ;;  %v165_v51 = vmul.f32 %v149_v47, %v149_v47  ;;  %v166_v53 = vmul.f32 %v150_v48, %v150_v48  ;;  %v167_v55 = vmul.f32 %v151_v49, %v151_v49 }
  0x8c   :  { %v168_v58 = vmul.f32 %v152_v52, %v152_v52  ;;  %v169_v61 = vmul.f32 %v153_v54, %v153_v54  ;;  %v156_v63 = vsub.f32 %v117_v20, %v147_v45  ;;  %v170_v0 = vmul.f32 %v154_v57, %v154_v57 }
  0x8d   :  { %v180_v56 = vadd.f32 %v165_v51, %v164_v50  ;;  %v157_v2 = vsub.f32 %v118_v22, %v147_v45  ;;  %v171_v3 = vmul.f32 %v155_v60, %v155_v60  ;;  %v158_v5 = vsub.f32 %v119_v25, %v147_v45 }
  0x8e   :  { %v172_v6 = vmul.f32 %v156_v63, %v156_v63  ;;  %v159_v8 = vsub.f32 %v120_v27, %v147_v45  ;;  %v160_v11 = vsub.f32 %v121_v29, %v147_v45  ;;  %v161_v14 = vsub.f32 %v122_v32, %v147_v45 }
  0x8f   :  { %v181_v59 = vadd.f32 %v180_v56, %v166_v53  ;;  %v173_v9 = vmul.f32 %v157_v2, %v157_v2  ;;  %v174_v12 = vmul.f32 %v158_v5, %v158_v5  ;;  %v162_v17 = vsub.f32 %v123_v34, %v147_v45 }
  0x90   :  { %v175_v15 = vmul.f32 %v159_v8, %v159_v8  ;;  %v176_v18 = vmul.f32 %v160_v11, %v160_v11  ;;  %v163_v20 = vsub.f32 %v124_v36, %v147_v45  ;;  %v177_v21 = vmul.f32 %v161_v14, %v161_v14 }
  0x91   :  { %v182_v62 = vadd.f32 %v181_v59, %v167_v55  ;;  %v178_v23 = vmul.f32 %v162_v17, %v162_v17 }
  0x92   :  { %v179_v25 = vmul.f32 %v163_v20, %v163_v20 }
  0x93   :  { %v183_v1 = vadd.f32 %v182_v62, %v168_v58 }
  0x95   :  { %v184_v4 = vadd.f32 %v183_v1, %v169_v61 }
  0x97   :  { %v185_v7 = vadd.f32 %v184_v4, %v170_v0 }
  0x99   :  { %v186_v10 = vadd.f32 %v185_v7, %v171_v3 }
  0x9b   :  { %v187_v13 = vadd.f32 %v186_v10, %v172_v6 }
  0x9d   :  { %v188_v16 = vadd.f32 %v187_v13, %v173_v9 }
  0x9f   :  { %v189_v19 = vadd.f32 %v188_v16, %v174_v12 }
  0xa1   :  { %v190_v22 = vadd.f32 %v189_v19, %v175_v15 }
  0xa3   :  { %v191_v24 = vadd.f32 %v190_v22, %v176_v18 }
  0xa5   :  { %v192_v26 = vadd.f32 %v191_v24, %v177_v21  ;;  %v2091_v24 = vld [vmem:[#allocation5 + $0x10] sm:$0xff]  }
  0xa7   :  { %v193_v28 = vadd.f32 %v192_v26, %v178_v23  ;;  %v2089_v23 = vld [vmem:[#allocation5 + $0x8] sm:$0xff]   ;;  %v2097_v26 = vld [vmem:[#allocation5 + $0x20] sm:$0xff]  }
  0xa9   :  { %v194_v27 = vadd.f32 %v193_v28, %v179_v25  ;;  %v2095_v25 = vld [vmem:[#allocation5 + $0x18] sm:$0xff]   ;;  %v2101_v28 = vld [vmem:[#allocation5 + $0x28] sm:$0xff]  }
  0xab   :  { %v195_v30 = vrot.slane %v194_v27, 4 }
  0xad   :  { %v196_v31 = vadd.f32 %v195_v30, %v194_v27  ;;  %v2103_v27 = vld [vmem:[#allocation5 + $0x30] sm:$0xff]   ;;  %v2107_v30 = vld [vmem:[#allocation5 + $0x38] sm:$0xff]  }
  0xaf   :  { %v197_v29 = vrot.slane %v196_v31, 2 }
  0xb1   :  { %v198_v33 = vadd.f32 %v197_v29, %v196_v31  ;;  %v1797_v31 = vld [vmem:[#allocation8] sm:$0xff]   ;;  %v1798_v29 = vld [vmem:[#allocation8 + $0x8] sm:$0xff]  }
  0xb2   :  { %1643 = vmatprep.subr.bf16.mxu0 %v1797_v31 }
  0xb3   :  { %v199_v35 = vrot.slane %v198_v33, 1 }
  0xb5   :  { %v200_v32 = vadd.f32 %v199_v35, %v198_v33  ;;  %v1799_v33 = vld [vmem:[#allocation8 + $0x10] sm:$0xff]   ;;  %v1800_v35 = vld [vmem:[#allocation8 + $0x18] sm:$0xff]  }
  0xb7   :  { %v201_v37 = vmul.f32 0.0078125, %v200_v32  ;;  %v1801_v32 = vld [vmem:[#allocation8 + $0x20] sm:$0xff]  }
  0xb9   :  { %v202_v38 = vadd.f32 1e-05, %v201_v37  ;;  %v1802_v37 = vld [vmem:[#allocation8 + $0x28] sm:$0xff]  }
  0xbb   :  { %1813 = vrsqrt.f32 %v202_v38  ;;  %v1803_v38 = vld [vmem:[#allocation8 + $0x30] sm:$0xff]  }
  0xc5   :  { %v1814_v34 = vpop.eup %1813 }
  0xc6   :  { %v204_v39 = vmul.f32 %v1814_v34, %v148_v46  ;;  %v205_v36 = vmul.f32 %v1814_v34, %v149_v47  ;;  %v206_v40 = vmul.f32 %v1814_v34, %v150_v48  ;;  %v207_v41 = vmul.f32 %v1814_v34, %v151_v49 }
  0xc7   :  { %v208_v42 = vmul.f32 %v1814_v34, %v152_v52  ;;  %v209_v43 = vmul.f32 %v1814_v34, %v153_v54  ;;  %v210_v51 = vmul.f32 %v1814_v34, %v154_v57  ;;  %v211_v53 = vmul.f32 %v1814_v34, %v155_v60  ;;  %v2086_v57 = vld [vmem:[#allocation5] sm:$0xff]  }
  0xc8   :  { %v220_v44 = vpack.c.bf16 %v205_v36, %v204_v39  ;;  %v221_v45 = vpack.c.bf16 %v207_v41, %v206_v40  ;;  %v212_v55 = vmul.f32 %v1814_v34, %v156_v63  ;;  %v213_v56 = vmul.f32 %v1814_v34, %v157_v2  ;;  %1627 = vmatprep.mubr.bf16.mxu1 %v2086_v57  ;;  %v1452_v36 = vld [vmem:[%s2312_s5] ss:$0 sm:$0xff] }
  0xc9   :  { %v222_v50 = vpack.c.bf16 %v209_v43, %v208_v42  ;;  %v223_v58 = vpack.c.bf16 %v211_v53, %v210_v51  ;;  %v214_v61 = vmul.f32 %v1814_v34, %v158_v5  ;;  %v215_v46 = vmul.f32 %v1814_v34, %v159_v8 }
  0xca   :  { %1595 = vmatprep.mubr.bf16.mxu0 %v220_v44  ;;  %v224_v59 = vpack.c.bf16 %v213_v56, %v212_v55  ;;  %v216_v47 = vmul.f32 %v1814_v34, %v160_v11  ;;  %v217_v48 = vmul.f32 %v1814_v34, %v161_v14  ;;  %v218_v54 = vmul.f32 %v1814_v34, %v162_v17 }
  0xcb   :  { %1596 = vmatmul.mubr.bf16.vlgmr.msra.gmra.mrb[0].mxu0 %v221_v45  ;;  %v225_v49 = vpack.c.bf16 %v215_v46, %v214_v61  ;;  %v219_v62 = vmul.f32 %v1814_v34, %v163_v20  ;;  %v1804_v34 = vld [vmem:[#allocation8 + $0x38] sm:$0xff]  }
  0xcc   :  { %1599 = vmatprep.mubr.bf16.mxu0 %v222_v50  ;;  %v226_v52 = vpack.c.bf16 %v217_v48, %v216_v47  ;;  %1644 = vmatpush3.bf16.msra.mxu0 %v1797_v31 }
  0xcd   :  { %v227_v0 = vpack.c.bf16 %v219_v62, %v218_v54  ;;  %1645 = vmatprep.subr.bf16.mxu0 %v1798_v29 }
  0xd0   :  { %1646 = vmatpush3.bf16.msra.mxu0 %v1798_v29 }
  0xd1   :  { %1647 = vmatprep.subr.bf16.mxu0 %v1799_v33 }
  0xd3   :  { %1600 = vmatmul.mubr.bf16.gmra.mrb[4].mxu0 %v223_v58 }
  0xd4   :  { %1603 = vmatprep.mubr.bf16.mxu0 %v224_v59  ;;  %1648 = vmatpush3.bf16.msra.mxu0 %v1799_v33 }
  0xd5   :  { %1649 = vmatprep.subr.bf16.mxu0 %v1800_v35 }
  0xd8   :  { %1650 = vmatpush3.bf16.msra.mxu0 %v1800_v35 }
  0xd9   :  { %1651 = vmatprep.subr.bf16.mxu0 %v1801_v32 }
  0xdb   :  { %1604 = vmatmul.mubr.bf16.gmra.mrb[8].mxu0 %v225_v49 }
  0xdc   :  { %1607 = vmatprep.mubr.bf16.mxu0 %v226_v52  ;;  %1652 = vmatpush3.bf16.msra.mxu0 %v1801_v32 }
  0xdd   :  { %1653 = vmatprep.subr.bf16.mxu0 %v1802_v37 }
  0xe0   :  { %1654 = vmatpush3.bf16.msra.mxu0 %v1802_v37 }
  0xe1   :  { %1655 = vmatprep.subr.bf16.mxu0 %v1803_v38 }
  0xe3   :  { %1608 = vmatmul.mubr.bf16.gmra.mrb[12].mxu0 %v227_v0 }
  0xe4   :  { %1656 = vmatpush3.bf16.msra.mxu0 %v1803_v38 }
  0xe5   :  { %1657 = vmatprep.subr.bf16.mxu0 %v1804_v34 }
  0xe8   :  { %1658 = vmatpush3.bf16.msra.mxu0 %v1804_v34 }
 0x19e   :  { %v1597_v60 = vpop.f32.mrb[0].mxu0 }
 0x19f   :  { %v326_v63 = vpop.f32.mrb[1].mxu0 }
 0x1a0   :  { %v1598_v1 = vpop.f32.mrb[2].mxu0 }
 0x1a1   :  { %v391_v2 = vpack.c.bf16 %v1598_v1, %v1597_v60  ;;  %v329_v3 = vpop.f32.mrb[3].mxu0 }
 0x1a2   :  { %v390_v4 = vpack.c.bf16 %v329_v3, %v326_v63 }
 0x1a4   :  { %1611 = vmatprep.subr.bf16.mxu1 %v390_v4 }
 0x1a5   :  { %1612 = vmatpush3.bf16.msra.mxu1 %v390_v4 }
 0x1a6   :  { %v1601_v5 = vpop.f32.mrb[4].mxu0  ;;  %1613 = vmatprep.subr.bf16.mxu1 %v391_v2 }
 0x1a7   :  { %v342_v6 = vpop.f32.mrb[5].mxu0 }
 0x1a8   :  { %v1602_v7 = vpop.f32.mrb[6].mxu0 }
 0x1a9   :  { %v393_v8 = vpack.c.bf16 %v1602_v7, %v1601_v5  ;;  %v345_v9 = vpop.f32.mrb[7].mxu0  ;;  %1614 = vmatpush3.bf16.msra.mxu1 %v391_v2 }
 0x1aa   :  { %v392_v10 = vpack.c.bf16 %v345_v9, %v342_v6 }
 0x1ac   :  { %1615 = vmatprep.subr.bf16.mxu1 %v392_v10 }
 0x1ad   :  { %1616 = vmatpush3.bf16.msra.mxu1 %v392_v10 }
 0x1ae   :  { %v1605_v11 = vpop.f32.mrb[8].mxu0  ;;  %1617 = vmatprep.subr.bf16.mxu1 %v393_v8 }
 0x1af   :  { %v358_v12 = vpop.f32.mrb[9].mxu0 }
 0x1b0   :  { %v1606_v13 = vpop.f32.mrb[10].mxu0 }
 0x1b1   :  { %v395_v14 = vpack.c.bf16 %v1606_v13, %v1605_v11  ;;  %v361_v15 = vpop.f32.mrb[11].mxu0  ;;  %1618 = vmatpush3.bf16.msra.mxu1 %v393_v8 }
 0x1b2   :  { %v394_v16 = vpack.c.bf16 %v361_v15, %v358_v12 }
 0x1b4   :  { %1619 = vmatprep.subr.bf16.mxu1 %v394_v16 }
 0x1b5   :  { %1620 = vmatpush3.bf16.msra.mxu1 %v394_v16 }
 0x1b6   :  { %v1609_v17 = vpop.f32.mrb[12].mxu0  ;;  %1621 = vmatprep.subr.bf16.mxu1 %v395_v14 }
 0x1b7   :  { %v374_v18 = vpop.f32.mrb[13].mxu0 }
 0x1b8   :  { %v1610_v19 = vpop.f32.mrb[14].mxu0 }
 0x1b9   :  { %v397_v20 = vpack.c.bf16 %v1610_v19, %v1609_v17  ;;  %v377_v21 = vpop.f32.mrb[15].mxu0  ;;  %1622 = vmatpush3.bf16.msra.mxu1 %v395_v14 }
 0x1ba   :  { %v396_v22 = vpack.c.bf16 %v377_v21, %v374_v18 }
 0x1bc   :  { %1623 = vmatprep.subr.bf16.mxu1 %v396_v22 }
 0x1bd   :  { %1624 = vmatpush3.bf16.msra.mxu1 %v396_v22 }
 0x1be   :  { %1625 = vmatprep.subr.bf16.mxu1 %v397_v20 }
 0x1c1   :  { %1626 = vmatpush3.bf16.msra.mxu1 %v397_v20 }
 0x1c4   :  { %1628 = vmatmul.mubr.bf16.vlgmr.msra.gmra.mrb[0].mxu1 %v2089_v23 }
 0x1c5   :  { %1631 = vmatprep.mubr.bf16.mxu1 %v2091_v24 }
 0x1cc   :  { %1632 = vmatmul.mubr.bf16.gmra.mrb[4].mxu1 %v2095_v25 }
 0x1cd   :  { %1635 = vmatprep.mubr.bf16.mxu1 %v2097_v26 }
 0x1d4   :  { %1636 = vmatmul.mubr.bf16.gmra.mrb[8].mxu1 %v2101_v28 }
 0x1d5   :  { %1639 = vmatprep.mubr.bf16.mxu1 %v2103_v27 }
 0x1dc   :  { %1640 = vmatmul.mubr.bf16.gmra.mrb[12].mxu1 %v2107_v30 }
 0x1dd   :  { %1691 = vmatprep.mubr.bf16.mxu1 %v2086_v57 }
 0x297   :  { %v1629_v39 = vpop.f32.mrb[0].mxu1 }
 0x298   :  { %v484_v40 = vpop.f32.mrb[1].mxu1  ;;  %v493_v45 = vadd.f32 %v1629_v39, %v1452_v36 }
 0x299   :  { %v1630_v41 = vpop.f32.mrb[2].mxu1  ;;  %v485_v43 = vadd.f32 %v1452_v36, %v484_v40 }
 0x29a   :  { %v487_v42 = vpop.f32.mrb[3].mxu1  ;;  %v496_v51 = vadd.f32 %v1630_v41, %v1452_v36 }
 0x29b   :  { %v488_v44 = vadd.f32 %v1452_v36, %v487_v42 }
 0x29d   :  { %v549_v50 = vadd.f32 %v488_v44, %v485_v43 }
 0x29f   :  { %v550_v53 = vadd.f32 %v549_v50, %v493_v45  ;;  %v1633_v55 = vpop.f32.mrb[4].mxu1 }
 0x2a0   :  { %v500_v56 = vpop.f32.mrb[5].mxu1  ;;  %v509_v49 = vadd.f32 %v1633_v55, %v1452_v36 }
 0x2a1   :  { %v501_v58 = vadd.f32 %v1452_v36, %v500_v56  ;;  %v551_v59 = vadd.f32 %v550_v53, %v496_v51  ;;  %v1634_v61 = vpop.f32.mrb[6].mxu1 }
 0x2a2   :  { %v503_v46 = vpop.f32.mrb[7].mxu1  ;;  %v512_v54 = vadd.f32 %v1634_v61, %v1452_v36 }
 0x2a3   :  { %v552_v47 = vadd.f32 %v551_v59, %v501_v58  ;;  %v504_v48 = vadd.f32 %v1452_v36, %v503_v46 }
 0x2a5   :  { %v553_v52 = vadd.f32 %v552_v47, %v504_v48 }
 0x2a7   :  { %v554_v62 = vadd.f32 %v553_v52, %v509_v49  ;;  %v1637_v0 = vpop.f32.mrb[8].mxu1 }
 0x2a8   :  { %v516_v60 = vpop.f32.mrb[9].mxu1  ;;  %v525_v6 = vadd.f32 %v1637_v0, %v1452_v36 }
 0x2a9   :  { %v517_v63 = vadd.f32 %v1452_v36, %v516_v60  ;;  %v555_v1 = vadd.f32 %v554_v62, %v512_v54  ;;  %v1638_v2 = vpop.f32.mrb[10].mxu1 }
 0x2aa   :  { %v519_v3 = vpop.f32.mrb[11].mxu1  ;;  %v528_v8 = vadd.f32 %v1638_v2, %v1452_v36 }
 0x2ab   :  { %v556_v4 = vadd.f32 %v555_v1, %v517_v63  ;;  %v520_v5 = vadd.f32 %v1452_v36, %v519_v3 }
 0x2ad   :  { %v557_v7 = vadd.f32 %v556_v4, %v520_v5 }
 0x2af   :  { %v558_v9 = vadd.f32 %v557_v7, %v525_v6  ;;  %v1641_v10 = vpop.f32.mrb[12].mxu1 }
 0x2b0   :  { %v532_v11 = vpop.f32.mrb[13].mxu1  ;;  %v541_v18 = vadd.f32 %v1641_v10, %v1452_v36 }
 0x2b1   :  { %v533_v12 = vadd.f32 %v1452_v36, %v532_v11  ;;  %v559_v13 = vadd.f32 %v558_v9, %v528_v8  ;;  %v1642_v14 = vpop.f32.mrb[14].mxu1 }
 0x2b2   :  { %v535_v15 = vpop.f32.mrb[15].mxu1  ;;  %v544_v20 = vadd.f32 %v1642_v14, %v1452_v36 }
 0x2b3   :  { %v560_v16 = vadd.f32 %v559_v13, %v533_v12  ;;  %v536_v17 = vadd.f32 %v1452_v36, %v535_v15 }
 0x2b5   :  { %v561_v19 = vadd.f32 %v560_v16, %v536_v17 }
 0x2b7   :  { %v562_v21 = vadd.f32 %v561_v19, %v541_v18 }
 0x2b9   :  { %v563_v22 = vadd.f32 %v562_v21, %v544_v20 }
 0x2bb   :  { %v564_v31 = vrot.slane %v563_v22, 4 }
 0x2bd   :  { %v565_v29 = vadd.f32 %v564_v31, %v563_v22 }
 0x2bf   :  { %v566_v33 = vrot.slane %v565_v29, 2 }
 0x2c1   :  { %v567_v35 = vadd.f32 %v566_v33, %v565_v29 }
 0x2c3   :  { %v568_v32 = vrot.slane %v567_v35, 1 }
 0x2c5   :  { %v569_v37 = vadd.f32 %v568_v32, %v567_v35 }
 0x2c7   :  { %v570_v38 = vmul.f32 0.0078125, %v569_v37 }
 0x2c9   :  { %v571_v34 = vsub.f32 %v485_v43, %v570_v38  ;;  %v572_v39 = vsub.f32 %v488_v44, %v570_v38  ;;  %v573_v40 = vsub.f32 %v493_v45, %v570_v38  ;;  %v574_v41 = vsub.f32 %v496_v51, %v570_v38 }
 0x2ca   :  { %v575_v42 = vsub.f32 %v501_v58, %v570_v38  ;;  %v576_v50 = vsub.f32 %v504_v48, %v570_v38  ;;  %v577_v53 = vsub.f32 %v509_v49, %v570_v38  ;;  %v2114_v55 = vsub.f32 %v512_v54, %v570_v38 }
 0x2cb   :  { %v2116_v56 = vsub.f32 %v517_v63, %v570_v38  ;;  %v2118_v36 = vsub.f32 %v520_v5, %v570_v38  ;;  %v2120_v59 = vsub.f32 %v525_v6, %v570_v38  ;;  %v2122_v61 = vsub.f32 %v528_v8, %v570_v38 }
 0x2cc   :  { %v2124_v46 = vsub.f32 %v533_v12, %v570_v38  ;;  %v584_v47 = vsub.f32 %v536_v17, %v570_v38  ;;  %v2126_v43 = vsub.f32 %v541_v18, %v570_v38  ;;  %v2128_v44 = vsub.f32 %v544_v20, %v570_v38 }
 0x2cd   :  { %v587_v45 = vmul.f32 %v571_v34, %v571_v34  ;;  %v588_v51 = vmul.f32 %v572_v39, %v572_v39  ;;  %v589_v58 = vmul.f32 %v573_v40, %v573_v40  ;;  %v590_v49 = vmul.f32 %v574_v41, %v574_v41 }
 0x2ce   :  { %v591_v54 = vmul.f32 %v575_v42, %v575_v42  ;;  %v592_v0 = vmul.f32 %v576_v50, %v576_v50  ;;  %v593_v63 = vmul.f32 %v577_v53, %v577_v53  ;;  %v594_v2 = vmul.f32 %v2114_v55, %v2114_v55 }
 0x2cf   :  { %v603_v48 = vadd.f32 %v588_v51, %v587_v45  ;;  %v595_v4 = vmul.f32 %v2116_v56, %v2116_v56  ;;  %v596_v6 = vmul.f32 %v2118_v36, %v2118_v36  ;;  %v597_v8 = vmul.f32 %v2120_v59, %v2120_v59  ;;  %v2149_v45 = vld [vmem:[%s2312_s5 + $0x3] ss:$0 sm:$0xff] }
 0x2d0   :  { %v598_v10 = vmul.f32 %v2122_v61, %v2122_v61  ;;  %v599_v12 = vmul.f32 %v2124_v46, %v2124_v46  ;;  %v600_v14 = vmul.f32 %v584_v47, %v584_v47  ;;  %v601_v16 = vmul.f32 %v2126_v43, %v2126_v43 }
 0x2d1   :  { %v604_v52 = vadd.f32 %v603_v48, %v589_v58  ;;  %v602_v18 = vmul.f32 %v2128_v44, %v2128_v44 }
 0x2d3   :  { %v605_v62 = vadd.f32 %v604_v52, %v590_v49  ;;  %v2154_v52 = vld [vmem:[%s2312_s5 + $0x5] ss:$0 sm:$0xff] }
 0x2d5   :  { %v606_v60 = vadd.f32 %v605_v62, %v591_v54 }
 0x2d7   :  { %v607_v1 = vadd.f32 %v606_v60, %v592_v0 }
 0x2d9   :  { %v608_v3 = vadd.f32 %v607_v1, %v593_v63 }
 0x2db   :  { %v609_v5 = vadd.f32 %v608_v3, %v594_v2 }
 0x2dd   :  { %v610_v7 = vadd.f32 %v609_v5, %v595_v4 }
 0x2df   :  { %v611_v9 = vadd.f32 %v610_v7, %v596_v6 }
 0x2e1   :  { %v612_v11 = vadd.f32 %v611_v9, %v597_v8 }
 0x2e3   :  { %v613_v13 = vadd.f32 %v612_v11, %v598_v10 }
 0x2e5   :  { %v614_v15 = vadd.f32 %v613_v13, %v599_v12 }
 0x2e7   :  { %v615_v17 = vadd.f32 %v614_v15, %v600_v14 }
 0x2e9   :  { %v616_v19 = vadd.f32 %v615_v17, %v601_v16 }
 0x2eb   :  { %v617_v20 = vadd.f32 %v616_v19, %v602_v18 }
 0x2ed   :  { %v618_v21 = vrot.slane %v617_v20, 4 }
 0x2ef   :  { %v619_v22 = vadd.f32 %v618_v21, %v617_v20 }
 0x2f1   :  { %v620_v31 = vrot.slane %v619_v22, 2 }
 0x2f3   :  { %v621_v29 = vadd.f32 %v620_v31, %v619_v22 }
 0x2f5   :  { %v622_v33 = vrot.slane %v621_v29, 1 }
 0x2f7   :  { %v623_v35 = vadd.f32 %v622_v33, %v621_v29 }
 0x2f9   :  { %v624_v32 = vmul.f32 0.0078125, %v623_v35 }
 0x2fb   :  { %v625_v37 = vadd.f32 1e-05, %v624_v32 }
 0x2fd   :  { %1815 = vrsqrt.f32 %v625_v37 }
 0x307   :  { %v1816_v38 = vpop.eup %1815 }
 0x308   :  { %v640_v51 = vmul.f32 %v1816_v38, %v584_v47  ;;  %v627_v58 = vmul.f32 %v1816_v38, %v571_v34  ;;  %v628_v48 = vmul.f32 %v1816_v38, %v572_v39  ;;  %v629_v49 = vmul.f32 %v1816_v38, %v573_v40 }
 0x309   :  { %v630_v54 = vmul.f32 %v1816_v38, %v574_v41  ;;  %v631_v62 = vmul.f32 %v1816_v38, %v575_v42  ;;  %v632_v0 = vmul.f32 %v1816_v38, %v576_v50  ;;  %v633_v60 = vmul.f32 %v1816_v38, %v577_v53 }
 0x30a   :  { %v660_v63 = vmul.f32 %v2149_v45, %v640_v51  ;;  %v647_v1 = vmul.f32 %v2149_v45, %v627_v58  ;;  %v648_v2 = vmul.f32 %v2149_v45, %v628_v48  ;;  %v649_v47 = vmul.f32 %v2149_v45, %v629_v49 }
 0x30b   :  { %v650_v34 = vmul.f32 %v2149_v45, %v630_v54  ;;  %v651_v39 = vmul.f32 %v2149_v45, %v631_v62  ;;  %v652_v40 = vmul.f32 %v2149_v45, %v632_v0  ;;  %v634_v3 = vmul.f32 %v1816_v38, %v2114_v55 }
 0x30c   :  { %v667_v41 = vadd.f32 %v2154_v52, %v647_v1  ;;  %v668_v42 = vadd.f32 %v2154_v52, %v648_v2  ;;  %v669_v50 = vadd.f32 %v2154_v52, %v649_v47  ;;  %v653_v53 = vmul.f32 %v2149_v45, %v633_v60 }
 0x30d   :  { %v670_v4 = vadd.f32 %v2154_v52, %v650_v34  ;;  %v671_v5 = vadd.f32 %v2154_v52, %v651_v39  ;;  %v672_v6 = vadd.f32 %v2154_v52, %v652_v40  ;;  %v654_v7 = vmul.f32 %v2149_v45, %v634_v3 }
 0x30e   :  { %v683_v8 = vmax.f32 %v667_v41, 0.0  ;;  %v684_v9 = vmax.f32 %v668_v42, 0.0  ;;  %v685_v10 = vmax.f32 %v669_v50, 0.0  ;;  %v673_v55 = vadd.f32 %v2154_v52, %v653_v53 }
 0x30f   :  { %v686_v11 = vmax.f32 %v670_v4, 0.0  ;;  %v687_v12 = vmax.f32 %v671_v5, 0.0  ;;  %v688_v13 = vmax.f32 %v672_v6, 0.0  ;;  %v674_v14 = vadd.f32 %v2154_v52, %v654_v7 }
 0x310   :  { %v699_v15 = vpack.c.bf16 %v684_v9, %v683_v8  ;;  %v689_v16 = vmax.f32 %v673_v55, 0.0  ;;  %v635_v17 = vmul.f32 %v1816_v38, %v2116_v56  ;;  %v636_v18 = vmul.f32 %v1816_v38, %v2118_v36 }
 0x311   :  { %v700_v19 = vpack.c.bf16 %v686_v11, %v685_v10  ;;  %v701_v20 = vpack.c.bf16 %v688_v13, %v687_v12  ;;  %v690_v21 = vmax.f32 %v674_v14, 0.0  ;;  %v637_v22 = vmul.f32 %v1816_v38, %v2120_v59 }
 0x312   :  { %1659 = vmatprep.mubr.bf16.mxu0 %v699_v15  ;;  %v655_v31 = vmul.f32 %v2149_v45, %v635_v17  ;;  %v656_v29 = vmul.f32 %v2149_v45, %v636_v18  ;;  %v638_v33 = vmul.f32 %v1816_v38, %v2122_v61  ;;  %v639_v35 = vmul.f32 %v1816_v38, %v2124_v46 }
 0x313   :  { %1660 = vmatmul.mubr.bf16.vlgmr.msra.gmra.mrb[16].mxu0 %v700_v19  ;;  %v702_v32 = vpack.c.bf16 %v690_v21, %v689_v16  ;;  %v657_v56 = vmul.f32 %v2149_v45, %v637_v22  ;;  %v680_v36 = vadd.f32 %v2154_v52, %v660_v63  ;;  %v641_v37 = vmul.f32 %v1816_v38, %v2126_v43 }
 0x314   :  { %1663 = vmatprep.mubr.bf16.mxu0 %v701_v20  ;;  %v675_v59 = vadd.f32 %v2154_v52, %v655_v31  ;;  %v676_v51 = vadd.f32 %v2154_v52, %v656_v29  ;;  %v658_v58 = vmul.f32 %v2149_v45, %v638_v33  ;;  %v659_v48 = vmul.f32 %v2149_v45, %v639_v35  ;;  %v1805_v31 = vld [vmem:[#allocation10] sm:$0xff]   ;;  %v1806_v29 = vld [vmem:[#allocation10 + $0x8] sm:$0xff]  }
 0x315   :  { %v677_v61 = vadd.f32 %v2154_v52, %v657_v56  ;;  %v696_v46 = vmax.f32 %v680_v36, 0.0  ;;  %v642_v49 = vmul.f32 %v1816_v38, %v2128_v44  ;;  %v661_v54 = vmul.f32 %v2149_v45, %v641_v37  ;;  %1707 = vmatprep.subr.bf16.mxu0 %v1805_v31 }
 0x316   :  { %v691_v62 = vmax.f32 %v675_v59, 0.0  ;;  %v692_v0 = vmax.f32 %v676_v51, 0.0  ;;  %v678_v43 = vadd.f32 %v2154_v52, %v658_v58  ;;  %v679_v60 = vadd.f32 %v2154_v52, %v659_v48  ;;  %1708 = vmatpush3.bf16.msra.mxu0 %v1805_v31 }
 0x317   :  { %v693_v63 = vmax.f32 %v677_v61, 0.0  ;;  %v662_v1 = vmul.f32 %v2149_v45, %v642_v49  ;;  %v681_v2 = vadd.f32 %v2154_v52, %v661_v54  ;;  %1709 = vmatprep.subr.bf16.mxu0 %v1806_v29 }
 0x318   :  { %v703_v47 = vpack.c.bf16 %v692_v0, %v691_v62  ;;  %v694_v34 = vmax.f32 %v678_v43, 0.0  ;;  %v695_v39 = vmax.f32 %v679_v60, 0.0 }
 0x319   :  { %v682_v40 = vadd.f32 %v2154_v52, %v662_v1  ;;  %v697_v3 = vmax.f32 %v681_v2, 0.0 }
 0x31a   :  { %v704_v44 = vpack.c.bf16 %v694_v34, %v693_v63  ;;  %v705_v38 = vpack.c.bf16 %v696_v46, %v695_v39  ;;  %1710 = vmatpush3.bf16.msra.mxu0 %v1806_v29 }
 0x31b   :  { %1664 = vmatmul.mubr.bf16.gmra.mrb[20].mxu0 %v702_v32  ;;  %v698_v41 = vmax.f32 %v682_v40, 0.0 }
 0x31c   :  { %1667 = vmatprep.mubr.bf16.mxu0 %v703_v47 }
 0x31d   :  { %v706_v42 = vpack.c.bf16 %v698_v41, %v697_v3 }
 0x323   :  { %1668 = vmatmul.mubr.bf16.gmra.mrb[24].mxu0 %v704_v44 }
 0x324   :  { %1671 = vmatprep.mubr.bf16.mxu0 %v705_v38 }
 0x32b   :  { %1672 = vmatmul.mubr.bf16.gmra.mrb[28].mxu0 %v706_v42 }
 0x3e6   :  { %v1661_v50 = vpop.f32.mrb[16].mxu0 }
 0x3e7   :  { %v805_v53 = vpop.f32.mrb[17].mxu0 }
 0x3e8   :  { %v1662_v45 = vpop.f32.mrb[18].mxu0 }
 0x3e9   :  { %v870_v4 = vpack.c.bf16 %v1662_v45, %v1661_v50  ;;  %v808_v5 = vpop.f32.mrb[19].mxu0 }
 0x3ea   :  { %v869_v6 = vpack.c.bf16 %v808_v5, %v805_v53 }
 0x3ec   :  { %1675 = vmatprep.subr.bf16.mxu1 %v869_v6 }
 0x3ed   :  { %1676 = vmatpush3.bf16.msra.mxu1 %v869_v6 }
 0x3ee   :  { %v1665_v7 = vpop.f32.mrb[20].mxu0  ;;  %1677 = vmatprep.subr.bf16.mxu1 %v870_v4 }
 0x3ef   :  { %v821_v52 = vpop.f32.mrb[21].mxu0 }
 0x3f0   :  { %v1666_v8 = vpop.f32.mrb[22].mxu0 }
 0x3f1   :  { %v872_v9 = vpack.c.bf16 %v1666_v8, %v1665_v7  ;;  %v824_v10 = vpop.f32.mrb[23].mxu0  ;;  %1678 = vmatpush3.bf16.msra.mxu1 %v870_v4 }
 0x3f2   :  { %v871_v55 = vpack.c.bf16 %v824_v10, %v821_v52 }
 0x3f4   :  { %1679 = vmatprep.subr.bf16.mxu1 %v871_v55 }
 0x3f5   :  { %1680 = vmatpush3.bf16.msra.mxu1 %v871_v55 }
 0x3f6   :  { %v1669_v11 = vpop.f32.mrb[24].mxu0  ;;  %1681 = vmatprep.subr.bf16.mxu1 %v872_v9 }
 0x3f7   :  { %v837_v12 = vpop.f32.mrb[25].mxu0 }
 0x3f8   :  { %v1670_v13 = vpop.f32.mrb[26].mxu0 }
 0x3f9   :  { %v874_v14 = vpack.c.bf16 %v1670_v13, %v1669_v11  ;;  %v840_v15 = vpop.f32.mrb[27].mxu0  ;;  %1682 = vmatpush3.bf16.msra.mxu1 %v872_v9 }
 0x3fa   :  { %v873_v16 = vpack.c.bf16 %v840_v15, %v837_v12 }
 0x3fc   :  { %1683 = vmatprep.subr.bf16.mxu1 %v873_v16 }
 0x3fd   :  { %1684 = vmatpush3.bf16.msra.mxu1 %v873_v16 }
 0x3fe   :  { %v1673_v17 = vpop.f32.mrb[28].mxu0  ;;  %1685 = vmatprep.subr.bf16.mxu1 %v874_v14 }
 0x3ff   :  { %v853_v18 = vpop.f32.mrb[29].mxu0 }
 0x400   :  { %v1674_v19 = vpop.f32.mrb[30].mxu0 }
 0x401   :  { %v876_v20 = vpack.c.bf16 %v1674_v19, %v1673_v17  ;;  %v856_v21 = vpop.f32.mrb[31].mxu0  ;;  %1686 = vmatpush3.bf16.msra.mxu1 %v874_v14 }
 0x402   :  { %v875_v22 = vpack.c.bf16 %v856_v21, %v853_v18 }
 0x404   :  { %1687 = vmatprep.subr.bf16.mxu1 %v875_v22 }
 0x405   :  { %1688 = vmatpush3.bf16.msra.mxu1 %v875_v22 }
 0x406   :  { %1689 = vmatprep.subr.bf16.mxu1 %v876_v20 }
 0x409   :  { %1690 = vmatpush3.bf16.msra.mxu1 %v876_v20 }
 0x40c   :  { %1692 = vmatmul.mubr.bf16.vlgmr.msra.gmra.mrb[16].mxu1 %v2089_v23  ;;  %v1807_v23 = vld [vmem:[#allocation10 + $0x10] sm:$0xff]  }
 0x40d   :  { %1695 = vmatprep.mubr.bf16.mxu1 %v2091_v24  ;;  %1711 = vmatprep.subr.bf16.mxu0 %v1807_v23  ;;  %v1808_v24 = vld [vmem:[#allocation10 + $0x18] sm:$0xff]  }
 0x40e   :  { %1712 = vmatpush3.bf16.msra.mxu0 %v1807_v23 }
 0x40f   :  { %1713 = vmatprep.subr.bf16.mxu0 %v1808_v24 }
 0x412   :  { %1714 = vmatpush3.bf16.msra.mxu0 %v1808_v24 }
 0x414   :  { %1696 = vmatmul.mubr.bf16.gmra.mrb[20].mxu1 %v2095_v25  ;;  %v1809_v25 = vld [vmem:[#allocation10 + $0x20] sm:$0xff]  }
 0x415   :  { %1699 = vmatprep.mubr.bf16.mxu1 %v2097_v26  ;;  %v1810_v26 = vld [vmem:[#allocation10 + $0x28] sm:$0xff]   ;;  %1715 = vmatprep.subr.bf16.mxu0 %v1809_v25 }
 0x416   :  { %1716 = vmatpush3.bf16.msra.mxu0 %v1809_v25 }
 0x417   :  { %1717 = vmatprep.subr.bf16.mxu0 %v1810_v26 }
 0x41a   :  { %1718 = vmatpush3.bf16.msra.mxu0 %v1810_v26 }
 0x41c   :  { %1700 = vmatmul.mubr.bf16.gmra.mrb[24].mxu1 %v2101_v28  ;;  %v1811_v28 = vld [vmem:[#allocation10 + $0x30] sm:$0xff]  }
 0x41d   :  { %1703 = vmatprep.mubr.bf16.mxu1 %v2103_v27  ;;  %1719 = vmatprep.subr.bf16.mxu0 %v1811_v28 }
 0x41e   :  { %1720 = vmatpush3.bf16.msra.mxu0 %v1811_v28 }
 0x424   :  { %1704 = vmatmul.mubr.bf16.gmra.mrb[28].mxu1 %v2107_v30  ;;  %v1471_v30 = vld [vmem:[%s2312_s5 + $0x1] ss:$0 sm:$0xff] }
 0x425   :  { %1755 = vmatprep.mubr.bf16.mxu1 %v2086_v57  ;;  %v1812_v57 = vld [vmem:[#allocation10 + $0x38] sm:$0xff]  }
 0x426   :  { %1721 = vmatprep.subr.bf16.mxu0 %v1812_v57 }
 0x427   :  { %1722 = vmatpush3.bf16.msra.mxu0 %v1812_v57 }
 0x4df   :  { %v1693_v27 = vpop.f32.mrb[16].mxu1 }
 0x4e0   :  { %v915_v33 = vpop.f32.mrb[17].mxu1  ;;  %v924_v37 = vadd.f32 %v1693_v27, %v1471_v30 }
 0x4e1   :  { %v1694_v35 = vpop.f32.mrb[18].mxu1  ;;  %v916_v56 = vadd.f32 %v1471_v30, %v915_v33 }
 0x4e2   :  { %v918_v32 = vpop.f32.mrb[19].mxu1  ;;  %v927_v51 = vadd.f32 %v1694_v35, %v1471_v30 }
 0x4e3   :  { %v919_v36 = vadd.f32 %v1471_v30, %v918_v32 }
 0x4e5   :  { %v980_v59 = vadd.f32 %v919_v36, %v916_v56 }
 0x4e7   :  { %v981_v58 = vadd.f32 %v980_v59, %v924_v37  ;;  %v1697_v48 = vpop.f32.mrb[20].mxu1 }
 0x4e8   :  { %v931_v61 = vpop.f32.mrb[21].mxu1  ;;  %v940_v60 = vadd.f32 %v1697_v48, %v1471_v30 }
 0x4e9   :  { %v932_v46 = vadd.f32 %v1471_v30, %v931_v61  ;;  %v982_v49 = vadd.f32 %v981_v58, %v927_v51  ;;  %v1698_v54 = vpop.f32.mrb[22].mxu1 }
 0x4ea   :  { %v934_v62 = vpop.f32.mrb[23].mxu1  ;;  %v943_v1 = vadd.f32 %v1698_v54, %v1471_v30 }
 0x4eb   :  { %v983_v0 = vadd.f32 %v982_v49, %v932_v46  ;;  %v935_v43 = vadd.f32 %v1471_v30, %v934_v62 }
 0x4ed   :  { %v984_v63 = vadd.f32 %v983_v0, %v935_v43 }
 0x4ef   :  { %v985_v2 = vadd.f32 %v984_v63, %v940_v60  ;;  %v1701_v47 = vpop.f32.mrb[24].mxu1 }
 0x4f0   :  { %v947_v34 = vpop.f32.mrb[25].mxu1  ;;  %v956_v42 = vadd.f32 %v1701_v47, %v1471_v30 }
 0x4f1   :  { %v948_v39 = vadd.f32 %v1471_v30, %v947_v34  ;;  %v986_v40 = vadd.f32 %v985_v2, %v943_v1  ;;  %v1702_v3 = vpop.f32.mrb[26].mxu1 }
 0x4f2   :  { %v950_v44 = vpop.f32.mrb[27].mxu1  ;;  %v959_v53 = vadd.f32 %v1702_v3, %v1471_v30 }
 0x4f3   :  { %v987_v38 = vadd.f32 %v986_v40, %v948_v39  ;;  %v951_v41 = vadd.f32 %v1471_v30, %v950_v44 }
 0x4f5   :  { %v988_v50 = vadd.f32 %v987_v38, %v951_v41 }
 0x4f7   :  { %v989_v45 = vadd.f32 %v988_v50, %v956_v42  ;;  %v1705_v4 = vpop.f32.mrb[28].mxu1 }
 0x4f8   :  { %v963_v5 = vpop.f32.mrb[29].mxu1  ;;  %v972_v55 = vadd.f32 %v1705_v4, %v1471_v30 }
 0x4f9   :  { %v964_v6 = vadd.f32 %v1471_v30, %v963_v5  ;;  %v990_v7 = vadd.f32 %v989_v45, %v959_v53  ;;  %v1706_v52 = vpop.f32.mrb[30].mxu1 }
 0x4fa   :  { %v966_v8 = vpop.f32.mrb[31].mxu1  ;;  %v975_v12 = vadd.f32 %v1706_v52, %v1471_v30 }
 0x4fb   :  { %v991_v9 = vadd.f32 %v990_v7, %v964_v6  ;;  %v967_v10 = vadd.f32 %v1471_v30, %v966_v8 }
 0x4fd   :  { %v992_v11 = vadd.f32 %v991_v9, %v967_v10 }
 0x4ff   :  { %v993_v13 = vadd.f32 %v992_v11, %v972_v55 }
 0x501   :  { %v994_v14 = vadd.f32 %v993_v13, %v975_v12 }
 0x503   :  { %v995_v15 = vrot.slane %v994_v14, 4 }
 0x505   :  { %v996_v16 = vadd.f32 %v995_v15, %v994_v14  ;;  %v2242_v14 = vld [vmem:[%s2312_s5 + $0x4] ss:$0 sm:$0xff] }
 0x507   :  { %v997_v17 = vrot.slane %v996_v16, 2 }
 0x509   :  { %v998_v18 = vadd.f32 %v997_v17, %v996_v16 }
 0x50b   :  { %v999_v19 = vrot.slane %v998_v18, 1 }
 0x50d   :  { %v1000_v20 = vadd.f32 %v999_v19, %v998_v18  ;;  %v2247_v19 = vld [vmem:[%s2312_s5 + $0x6] ss:$0 sm:$0xff] }
 0x50f   :  { %v1001_v21 = vmul.f32 0.0078125, %v1000_v20 }
 0x511   :  { %v1002_v22 = vsub.f32 %v916_v56, %v1001_v21  ;;  %v1003_v31 = vsub.f32 %v919_v36, %v1001_v21  ;;  %v1004_v29 = vsub.f32 %v924_v37, %v1001_v21  ;;  %v1005_v23 = vsub.f32 %v927_v51, %v1001_v21 }
 0x512   :  { %v1006_v24 = vsub.f32 %v932_v46, %v1001_v21  ;;  %v1007_v25 = vsub.f32 %v935_v43, %v1001_v21  ;;  %v1008_v26 = vsub.f32 %v940_v60, %v1001_v21  ;;  %v2207_v28 = vsub.f32 %v943_v1, %v1001_v21 }
 0x513   :  { %v2209_v57 = vsub.f32 %v948_v39, %v1001_v21  ;;  %v2211_v27 = vsub.f32 %v951_v41, %v1001_v21  ;;  %v2213_v30 = vsub.f32 %v956_v42, %v1001_v21  ;;  %v2215_v33 = vsub.f32 %v959_v53, %v1001_v21 }
 0x514   :  { %v2217_v35 = vsub.f32 %v964_v6, %v1001_v21  ;;  %v1015_v32 = vsub.f32 %v967_v10, %v1001_v21  ;;  %v2219_v56 = vsub.f32 %v972_v55, %v1001_v21  ;;  %v2221_v36 = vsub.f32 %v975_v12, %v1001_v21 }
 0x515   :  { %v1018_v37 = vmul.f32 %v1002_v22, %v1002_v22  ;;  %v1019_v59 = vmul.f32 %v1003_v31, %v1003_v31  ;;  %v1020_v51 = vmul.f32 %v1004_v29, %v1004_v29  ;;  %v1021_v48 = vmul.f32 %v1005_v23, %v1005_v23 }
 0x516   :  { %v1022_v46 = vmul.f32 %v1006_v24, %v1006_v24  ;;  %v1023_v54 = vmul.f32 %v1007_v25, %v1007_v25  ;;  %v1024_v0 = vmul.f32 %v1008_v26, %v1008_v26  ;;  %v1025_v60 = vmul.f32 %v2207_v28, %v2207_v28 }
 0x517   :  { %v1034_v58 = vadd.f32 %v1019_v59, %v1018_v37  ;;  %v1026_v1 = vmul.f32 %v2209_v57, %v2209_v57  ;;  %v1027_v47 = vmul.f32 %v2211_v27, %v2211_v27  ;;  %v1028_v39 = vmul.f32 %v2213_v30, %v2213_v30 }
 0x518   :  { %v1029_v3 = vmul.f32 %v2215_v33, %v2215_v33  ;;  %v1030_v38 = vmul.f32 %v2217_v35, %v2217_v35  ;;  %v1031_v42 = vmul.f32 %v1015_v32, %v1015_v32  ;;  %v1032_v53 = vmul.f32 %v2219_v56, %v2219_v56 }
 0x519   :  { %v1035_v61 = vadd.f32 %v1034_v58, %v1020_v51  ;;  %v1033_v4 = vmul.f32 %v2221_v36, %v2221_v36 }
 0x51b   :  { %v1036_v49 = vadd.f32 %v1035_v61, %v1021_v48 }
 0x51d   :  { %v1037_v62 = vadd.f32 %v1036_v49, %v1022_v46 }
 0x51f   :  { %v1038_v43 = vadd.f32 %v1037_v62, %v1023_v54 }
 0x521   :  { %v1039_v63 = vadd.f32 %v1038_v43, %v1024_v0 }
 0x523   :  { %v1040_v2 = vadd.f32 %v1039_v63, %v1025_v60 }
 0x525   :  { %v1041_v34 = vadd.f32 %v1040_v2, %v1026_v1 }
 0x527   :  { %v1042_v40 = vadd.f32 %v1041_v34, %v1027_v47 }
 0x529   :  { %v1043_v44 = vadd.f32 %v1042_v40, %v1028_v39 }
 0x52b   :  { %v1044_v41 = vadd.f32 %v1043_v44, %v1029_v3 }
 0x52d   :  { %v1045_v50 = vadd.f32 %v1044_v41, %v1030_v38 }
 0x52f   :  { %v1046_v45 = vadd.f32 %v1045_v50, %v1031_v42 }
 0x531   :  { %v1047_v5 = vadd.f32 %v1046_v45, %v1032_v53 }
 0x533   :  { %v1048_v6 = vadd.f32 %v1047_v5, %v1033_v4 }
 0x535   :  { %v1049_v7 = vrot.slane %v1048_v6, 4 }
 0x537   :  { %v1050_v52 = vadd.f32 %v1049_v7, %v1048_v6 }
 0x539   :  { %v1051_v8 = vrot.slane %v1050_v52, 2 }
 0x53b   :  { %v1052_v9 = vadd.f32 %v1051_v8, %v1050_v52 }
 0x53d   :  { %v1053_v10 = vrot.slane %v1052_v9, 1 }
 0x53f   :  { %v1054_v55 = vadd.f32 %v1053_v10, %v1052_v9 }
 0x541   :  { %v1055_v11 = vmul.f32 0.0078125, %v1054_v55 }
 0x543   :  { %v1056_v12 = vadd.f32 1e-05, %v1055_v11 }
 0x545   :  { %1817 = vrsqrt.f32 %v1056_v12 }
 0x54f   :  { %v1818_v13 = vpop.eup %1817 }
 0x550   :  { %v1071_v15 = vmul.f32 %v1818_v13, %v1015_v32  ;;  %v1058_v16 = vmul.f32 %v1818_v13, %v1002_v22  ;;  %v1059_v17 = vmul.f32 %v1818_v13, %v1003_v31  ;;  %v1060_v18 = vmul.f32 %v1818_v13, %v1004_v29 }
 0x551   :  { %v1061_v20 = vmul.f32 %v1818_v13, %v1005_v23  ;;  %v1062_v21 = vmul.f32 %v1818_v13, %v1006_v24  ;;  %v1063_v37 = vmul.f32 %v1818_v13, %v1007_v25  ;;  %v1064_v59 = vmul.f32 %v1818_v13, %v1008_v26 }
 0x552   :  { %v1091_v51 = vmul.f32 %v2242_v14, %v1071_v15  ;;  %v1078_v58 = vmul.f32 %v2242_v14, %v1058_v16  ;;  %v1079_v48 = vmul.f32 %v2242_v14, %v1059_v17  ;;  %v1080_v32 = vmul.f32 %v2242_v14, %v1060_v18 }
 0x553   :  { %v1081_v22 = vmul.f32 %v2242_v14, %v1061_v20  ;;  %v1082_v31 = vmul.f32 %v2242_v14, %v1062_v21  ;;  %v1083_v29 = vmul.f32 %v2242_v14, %v1063_v37  ;;  %v1065_v61 = vmul.f32 %v1818_v13, %v2207_v28 }
 0x554   :  { %v1098_v23 = vadd.f32 %v2247_v19, %v1078_v58  ;;  %v1099_v24 = vadd.f32 %v2247_v19, %v1079_v48  ;;  %v1100_v25 = vadd.f32 %v2247_v19, %v1080_v32  ;;  %v1084_v26 = vmul.f32 %v2242_v14, %v1064_v59 }
 0x555   :  { %v1101_v46 = vadd.f32 %v2247_v19, %v1081_v22  ;;  %v1102_v49 = vadd.f32 %v2247_v19, %v1082_v31  ;;  %v1103_v54 = vadd.f32 %v2247_v19, %v1083_v29  ;;  %v1085_v62 = vmul.f32 %v2242_v14, %v1065_v61 }
 0x556   :  { %v1114_v0 = vmax.f32 %v1098_v23, 0.0  ;;  %v1115_v43 = vmax.f32 %v1099_v24, 0.0  ;;  %v1116_v60 = vmax.f32 %v1100_v25, 0.0  ;;  %v1104_v28 = vadd.f32 %v2247_v19, %v1084_v26 }
 0x557   :  { %v1117_v63 = vmax.f32 %v1101_v46, 0.0  ;;  %v1118_v1 = vmax.f32 %v1102_v49, 0.0  ;;  %v1119_v2 = vmax.f32 %v1103_v54, 0.0  ;;  %v1105_v47 = vadd.f32 %v2247_v19, %v1085_v62 }
 0x558   :  { %v1130_v34 = vpack.c.bf16 %v1115_v43, %v1114_v0  ;;  %v1120_v39 = vmax.f32 %v1104_v28, 0.0  ;;  %v1066_v40 = vmul.f32 %v1818_v13, %v2209_v57  ;;  %v1067_v3 = vmul.f32 %v1818_v13, %v2211_v27 }
 0x559   :  { %v1131_v44 = vpack.c.bf16 %v1117_v63, %v1116_v60  ;;  %v1132_v38 = vpack.c.bf16 %v1119_v2, %v1118_v1  ;;  %v1121_v41 = vmax.f32 %v1105_v47, 0.0  ;;  %v1068_v42 = vmul.f32 %v1818_v13, %v2213_v30 }
 0x55a   :  { %1723 = vmatprep.mubr.bf16.mxu0 %v1130_v34  ;;  %v1086_v50 = vmul.f32 %v2242_v14, %v1066_v40  ;;  %v1087_v53 = vmul.f32 %v2242_v14, %v1067_v3  ;;  %v1069_v45 = vmul.f32 %v1818_v13, %v2215_v33  ;;  %v1070_v4 = vmul.f32 %v1818_v13, %v2217_v35  ;;  %v1819_v34 = vld [vmem:[#allocation5 + $0x8] sm:$0xff]   ;;  %v1821_v40 = vld [vmem:[#allocation5 + $0x18] sm:$0xff]   ;;  %v1822_v3 = vld [vmem:[#allocation5 + $0x20] sm:$0xff]  }
 0x55b   :  { %1724 = vmatmul.mubr.bf16.vlgmr.msra.gmra.mrb[32].mxu0 %v1131_v44  ;;  %v1133_v5 = vpack.c.bf16 %v1121_v41, %v1120_v39  ;;  %v1088_v57 = vmul.f32 %v2242_v14, %v1068_v42  ;;  %v1111_v27 = vadd.f32 %v2247_v19, %v1091_v51  ;;  %v1072_v6 = vmul.f32 %v1818_v13, %v2219_v56  ;;  %v1820_v39 = vld [vmem:[#allocation5 + $0x10] sm:$0xff]   ;;  %v1823_v44 = vld [vmem:[#allocation5 + $0x28] sm:$0xff]   ;;  %v1825_v41 = vld [vmem:[#allocation5 + $0x38] sm:$0xff]  }
 0x55c   :  { %1727 = vmatprep.mubr.bf16.mxu0 %v1132_v38  ;;  %v1106_v30 = vadd.f32 %v2247_v19, %v1086_v50  ;;  %v1107_v7 = vadd.f32 %v2247_v19, %v1087_v53  ;;  %v1089_v52 = vmul.f32 %v2242_v14, %v1069_v45  ;;  %v1090_v8 = vmul.f32 %v2242_v14, %v1070_v4  ;;  %v1824_v38 = vld [vmem:[#allocation5 + $0x30] sm:$0xff]   ;;  %v1482_v42 = vld [vmem:[%s2312_s5 + $0x2] ss:$0 sm:$0xff]  ;;  %s1975_s5 = smov [#allocation11]  }
 0x55d   :  { %v1108_v33 = vadd.f32 %v2247_v19, %v1088_v57  ;;  %v1127_v35 = vmax.f32 %v1111_v27, 0.0  ;;  %v1073_v9 = vmul.f32 %v1818_v13, %v2221_v36  ;;  %v1092_v10 = vmul.f32 %v2242_v14, %v1072_v6  ;;  %s1430_s0 = sshll.u32 %s1975_s5, 4  ;;  %s1431_s0 = int_to_ptr.vmem [resolvable:$true] %s1430_s0 }
 0x55e   :  { %v1122_v55 = vmax.f32 %v1106_v30, 0.0  ;;  %v1123_v11 = vmax.f32 %v1107_v7, 0.0  ;;  %v1109_v56 = vadd.f32 %v2247_v19, %v1089_v52  ;;  %v1110_v12 = vadd.f32 %v2247_v19, %v1090_v8  ;;  %s1936_s14 = scalar_lea.vmem %s1431_s0, 2048  ;;  %p1941_p13 = scmp.lt.s32.totalorder %s1431_s0, %s1431_s0 }
 0x55f   :  { %v1124_v15 = vmax.f32 %v1108_v33, 0.0  ;;  %v1093_v16 = vmul.f32 %v2242_v14, %v1073_v9  ;;  %v1112_v17 = vadd.f32 %v2247_v19, %v1092_v10  ;;  %p1937_p12 = scmp.ne.s32.totalorder %s1431_s0, %s1936_s14  ;;  %p1942_p0 = scmp.lt.s32.totalorder %s1936_s14, %s1936_s14 }
 0x560   :  { %v1134_v18 = vpack.c.bf16 %v1123_v11, %v1122_v55  ;;  %v1125_v20 = vmax.f32 %v1109_v56, 0.0  ;;  %v1126_v21 = vmax.f32 %v1110_v12, 0.0 }
 0x561   :  { %v1113_v37 = vadd.f32 %v2247_v19, %v1093_v16  ;;  %v1128_v59 = vmax.f32 %v1112_v17, 0.0  ;;  %p1943_p1 = por %p1942_p0, %p1941_p13 }
 0x562   :  { %v1135_v36 = vpack.c.bf16 %v1125_v20, %v1124_v15  ;;  %v1136_v13 = vpack.c.bf16 %v1127_v35, %v1126_v21 }
 0x563   :  { %1728 = vmatmul.mubr.bf16.gmra.mrb[36].mxu0 %v1133_v5  ;;  %v1129_v51 = vmax.f32 %v1113_v37, 0.0  ;;  %p1944_p2 = pnand %p1943_p1, %p1937_p12 }
 0x564   :  { %1731 = vmatprep.mubr.bf16.mxu0 %v1134_v18 }
 0x565   :  { %v1137_v58 = vpack.c.bf16 %v1129_v51, %v1128_v59 }
 0x56b   :  { %1732 = vmatmul.mubr.bf16.gmra.mrb[40].mxu0 %v1135_v36 }
 0x56c   :  { %1735 = vmatprep.mubr.bf16.mxu0 %v1136_v13 }
 0x573   :  { %1736 = vmatmul.mubr.bf16.gmra.mrb[44].mxu0 %v1137_v58 }
 0x62e   :  { %v1725_v48 = vpop.f32.mrb[32].mxu0 }
 0x62f   :  { %v1236_v32 = vpop.f32.mrb[33].mxu0 }
 0x630   :  { %v1726_v14 = vpop.f32.mrb[34].mxu0 }
 0x631   :  { %v1301_v22 = vpack.c.bf16 %v1726_v14, %v1725_v48  ;;  %v1239_v31 = vpop.f32.mrb[35].mxu0 }
 0x632   :  { %v1300_v29 = vpack.c.bf16 %v1239_v31, %v1236_v32 }
 0x634   :  { %1739 = vmatprep.subr.bf16.mxu1 %v1300_v29 }
 0x635   :  { %1740 = vmatpush3.bf16.msra.mxu1 %v1300_v29 }
 0x636   :  { %v1729_v61 = vpop.f32.mrb[36].mxu0  ;;  %1741 = vmatprep.subr.bf16.mxu1 %v1301_v22 }
 0x637   :  { %v1252_v19 = vpop.f32.mrb[37].mxu0 }
 0x638   :  { %v1730_v23 = vpop.f32.mrb[38].mxu0 }
 0x639   :  { %v1303_v24 = vpack.c.bf16 %v1730_v23, %v1729_v61  ;;  %v1255_v25 = vpop.f32.mrb[39].mxu0  ;;  %1742 = vmatpush3.bf16.msra.mxu1 %v1301_v22 }
 0x63a   :  { %v1302_v26 = vpack.c.bf16 %v1255_v25, %v1252_v19 }
 0x63c   :  { %1743 = vmatprep.subr.bf16.mxu1 %v1302_v26 }
 0x63d   :  { %1744 = vmatpush3.bf16.msra.mxu1 %v1302_v26 }
 0x63e   :  { %v1733_v46 = vpop.f32.mrb[40].mxu0  ;;  %1745 = vmatprep.subr.bf16.mxu1 %v1303_v24 }
 0x63f   :  { %v1268_v49 = vpop.f32.mrb[41].mxu0 }
 0x640   :  { %v1734_v54 = vpop.f32.mrb[42].mxu0 }
 0x641   :  { %v1305_v62 = vpack.c.bf16 %v1734_v54, %v1733_v46  ;;  %v1271_v0 = vpop.f32.mrb[43].mxu0  ;;  %1746 = vmatpush3.bf16.msra.mxu1 %v1303_v24 }
 0x642   :  { %v1304_v43 = vpack.c.bf16 %v1271_v0, %v1268_v49 }
 0x644   :  { %1747 = vmatprep.subr.bf16.mxu1 %v1304_v43 }
 0x645   :  { %1748 = vmatpush3.bf16.msra.mxu1 %v1304_v43 }
 0x646   :  { %v1737_v60 = vpop.f32.mrb[44].mxu0  ;;  %1749 = vmatprep.subr.bf16.mxu1 %v1305_v62 }
 0x647   :  { %v1284_v28 = vpop.f32.mrb[45].mxu0 }
 0x648   :  { %v1738_v63 = vpop.f32.mrb[46].mxu0 }
 0x649   :  { %v1307_v1 = vpack.c.bf16 %v1738_v63, %v1737_v60  ;;  %v1287_v2 = vpop.f32.mrb[47].mxu0  ;;  %1750 = vmatpush3.bf16.msra.mxu1 %v1305_v62 }
 0x64a   :  { %v1306_v47 = vpack.c.bf16 %v1287_v2, %v1284_v28 }
 0x64c   :  { %1751 = vmatprep.subr.bf16.mxu1 %v1306_v47 }
 0x64d   :  { %1752 = vmatpush3.bf16.msra.mxu1 %v1306_v47 }
 0x64e   :  { %1753 = vmatprep.subr.bf16.mxu1 %v1307_v1 }
 0x651   :  { %1754 = vmatpush3.bf16.msra.mxu1 %v1307_v1 }
 0x654   :  { %1756 = vmatmul.mubr.bf16.vlgmr.msra.gmra.mrb[32].mxu1 %v1819_v34 }
 0x655   :  { %1759 = vmatprep.mubr.bf16.mxu1 %v1820_v39 }
 0x65c   :  { %1760 = vmatmul.mubr.bf16.gmra.mrb[36].mxu1 %v1821_v40 }
 0x65d   :  { %1763 = vmatprep.mubr.bf16.mxu1 %v1822_v3 }
 0x664   :  { %1764 = vmatmul.mubr.bf16.gmra.mrb[40].mxu1 %v1823_v44 }
 0x665   :  { %1767 = vmatprep.mubr.bf16.mxu1 %v1824_v38 }
 0x66c   :  { %1768 = vmatmul.mubr.bf16.gmra.mrb[44].mxu1 %v1825_v41 }
 0x727   :  { %v1757_v50 = vpop.f32.mrb[32].mxu1 }
 0x728   :  { %v1355_v53 = vadd.f32 %v1757_v50, %v1482_v42  ;;  %v1346_v45 = vpop.f32.mrb[33].mxu1 }
 0x729   :  { %v1347_v4 = vadd.f32 %v1482_v42, %v1346_v45  ;;  %v1758_v5 = vpop.f32.mrb[34].mxu1 }
 0x72a   :  { %1411 = vst [vmem:[#allocation11 + $0x10] sm:$0xff] %v1355_v53  ;;  %v1358_v57 = vadd.f32 %v1758_v5, %v1482_v42  ;;  %v1349_v27 = vpop.f32.mrb[35].mxu1 }
 0x72b   :  { %1409 = vst [vmem:[#allocation11] sm:$0xff] %v1347_v4  ;;  %v1350_v6 = vadd.f32 %v1482_v42, %v1349_v27 }
 0x72c   :  { %1412 = vst [vmem:[#allocation11 + $0x18] sm:$0xff] %v1358_v57 }
 0x72d   :  { %1410 = vst [vmem:[#allocation11 + $0x8] sm:$0xff] %v1350_v6 }
 0x72f   :  { %v1761_v30 = vpop.f32.mrb[36].mxu1 }
 0x730   :  { %v1371_v7 = vadd.f32 %v1761_v30, %v1482_v42  ;;  %v1362_v52 = vpop.f32.mrb[37].mxu1 }
 0x731   :  { %v1363_v8 = vadd.f32 %v1482_v42, %v1362_v52  ;;  %v1762_v33 = vpop.f32.mrb[38].mxu1 }
 0x732   :  { %1415 = vst [vmem:[#allocation11 + $0x30] sm:$0xff] %v1371_v7  ;;  %v1374_v35 = vadd.f32 %v1762_v33, %v1482_v42  ;;  %v1365_v9 = vpop.f32.mrb[39].mxu1 }
 0x733   :  { %1413 = vst [vmem:[#allocation11 + $0x20] sm:$0xff] %v1363_v8  ;;  %v1366_v10 = vadd.f32 %v1482_v42, %v1365_v9 }
 0x734   :  { %1416 = vst [vmem:[#allocation11 + $0x38] sm:$0xff] %v1374_v35 }
 0x735   :  { %1414 = vst [vmem:[#allocation11 + $0x28] sm:$0xff] %v1366_v10 }
 0x737   :  { %v1765_v55 = vpop.f32.mrb[40].mxu1 }
 0x738   :  { %v1387_v11 = vadd.f32 %v1765_v55, %v1482_v42  ;;  %v1378_v56 = vpop.f32.mrb[41].mxu1 }
 0x739   :  { %v1379_v12 = vadd.f32 %v1482_v42, %v1378_v56  ;;  %v1766_v15 = vpop.f32.mrb[42].mxu1 }
 0x73a   :  { %1419 = vst [vmem:[#allocation11 + $0x50] sm:$0xff] %v1387_v11  ;;  %v1390_v16 = vadd.f32 %v1766_v15, %v1482_v42  ;;  %v1381_v17 = vpop.f32.mrb[43].mxu1 }
 0x73b   :  { %1417 = vst [vmem:[#allocation11 + $0x40] sm:$0xff] %v1379_v12  ;;  %v1382_v18 = vadd.f32 %v1482_v42, %v1381_v17 }
 0x73c   :  { %1420 = vst [vmem:[#allocation11 + $0x58] sm:$0xff] %v1390_v16 }
 0x73d   :  { %1418 = vst [vmem:[#allocation11 + $0x48] sm:$0xff] %v1382_v18 }
 0x73f   :  { %v1769_v20 = vpop.f32.mrb[44].mxu1 }
 0x740   :  { %v1403_v21 = vadd.f32 %v1769_v20, %v1482_v42  ;;  %v1394_v37 = vpop.f32.mrb[45].mxu1 }
 0x741   :  { %v1395_v59 = vadd.f32 %v1482_v42, %v1394_v37  ;;  %v1770_v36 = vpop.f32.mrb[46].mxu1 }
 0x742   :  { %1423 = vst [vmem:[#allocation11 + $0x70] sm:$0xff] %v1403_v21  ;;  %v1406_v13 = vadd.f32 %v1770_v36, %v1482_v42  ;;  %v1397_v51 = vpop.f32.mrb[47].mxu1 }
 0x743   :  { %1421 = vst [vmem:[#allocation11 + $0x60] sm:$0xff] %v1395_v59  ;;  %v1398_v58 = vadd.f32 %v1482_v42, %v1397_v51 }
 0x744   :  { %1424 = vst [vmem:[#allocation11 + $0x78] sm:$0xff] %v1406_v13 }
 0x745   :  { %1422 = vst [vmem:[#allocation11 + $0x68] sm:$0xff] %v1398_v58 }
 0x746   :  { %1947 = shalt.err (!%p1944_p2)
}
 0x747   :  { %s1948_s26 = scalar_lea.hbm %s2313_s6, 2048 }
 0x748   :  { %p1949_p3 = scmp.ne.s32.totalorder %s2313_s6, %s1948_s26  ;;  %p1952_p4 = scmp.lt.u32.totalorder %s1948_s26, %s2313_s6 }
 0x74a   :  { %p1954_p5 = pnand %p1952_p4, %p1949_p3 }
 0x74c   :  { %1957 = shalt.err (!%p1954_p5)
}
 0x74d   :  { %1436 = dma.vmem_to_hbm [thread:$0]  %s1431_s0, 2048, %s2313_s6, [#allocation4], %s1971_s3, %s1971_s3, %s1972_s10  }
 0x74e   :  { %1964 = dma.done.wait [#allocation4], 2048  }
 0x74f   :  { %1965 = vsyncadd [#allocation4], 4294965248 }
 0x750   :  { %1440 = vsyncpa [#allocation3], 1 }
 0x751   :  { %1441 = vsyncpa [#allocation6], 1 }
 0x752   :  { %1442 = vsyncpa [#allocation9], 1 }
 0x753   :  { %1443 = vsyncpa [#allocation4], 1 }

</bundles_post_ra>
